<compile_context>
chip_gen: v7x
topology: tpu7x:2x2x1
jax: 0.10.0
libtpu: 0.0.40
codegen_flags: <defaults>
</compile_context>

<pallas_src>
import functools

import jax
import jax.numpy as jnp
from jax.experimental import pallas as pl
from jax.experimental.pallas import tpu as pltpu

ITER = 3
ALPHA = 0.2
SMOOTH = 1.0


# ---------------------------------------------------------------------------
# Per-generation tuning (block size / VMEM limit / bf16 skeleton / #TCs).
# ---------------------------------------------------------------------------
def _device_config():
    kind = ""
    try:
        kind = jax.devices()[0].device_kind.lower()
    except Exception:
        pass
    if "v7" in kind:
        # 64 MiB VMEM per TC, 2 TCs/chip, bf16 VPU.
        return dict(block_target=5 << 18, vmem_limit=40 * 1024 * 1024,
                    min_blocks=2, bf16_ok=True)
    if "v6" in kind:
        # 128 MiB VMEM, bf16 VPU.
        return dict(block_target=2 << 20, vmem_limit=96 * 1024 * 1024,
                    min_blocks=1, bf16_ok=True)
    if "v5" in kind:
        # 128 MiB VMEM, no bf16 VPU -> keep the skeleton in f32.
        return dict(block_target=2 << 20, vmem_limit=96 * 1024 * 1024,
                    min_blocks=1, bf16_ok=False)
    # Unknown / older parts: conservative defaults.
    return dict(block_target=1 << 20, vmem_limit=32 * 1024 * 1024,
                min_blocks=1, bf16_ok=False)


# ---------------------------------------------------------------------------
# One-time, shape-independent pltpu.roll convention/support probe (per dtype).
# ---------------------------------------------------------------------------
_ROLL_SIGN_CACHE = {}


def _get_roll_sign(dtype):
    """+1 if pltpu.roll matches jnp.roll's convention, -1 if flipped,
    0 if unusable for this dtype (slice+concat fallback)."""
    key = jnp.dtype(dtype).name
    if key in _ROLL_SIGN_CACHE:
        return _ROLL_SIGN_CACHE[key]
    sign = 0
    try:
        # Values < 64 so the probe arithmetic is exact even in bf16.
        x = (jnp.arange(2 * 8 * 128, dtype=jnp.int32) % 61).astype(dtype)
        x = x.reshape(2, 8, 128)

        def probe_kernel(x_ref, o_ref):
            v = x_ref[...]
            o_ref[...] = pltpu.roll(v, 1, 1) + 2.0 * pltpu.roll(v, 1, 2)

        out = pl.pallas_call(
            probe_kernel,
            out_shape=jax.ShapeDtypeStruct((2, 8, 128), jnp.dtype(dtype)),
        )(x)
        out = jax.block_until_ready(out).astype(jnp.float32)
        xf = x.astype(jnp.float32)
        want_pos = jnp.roll(xf, 1, axis=1) + 2.0 * jnp.roll(xf, 1, axis=2)
        want_neg = jnp.roll(xf, -1, axis=1) + 2.0 * jnp.roll(xf, -1, axis=2)
        if bool(jnp.array_equal(out, want_pos)):
            sign = 1
        elif bool(jnp.array_equal(out, want_neg)):
            sign = -1
    except Exception:
        sign = 0
    _ROLL_SIGN_CACHE[key] = sign
    return sign


# ---------------------------------------------------------------------------
# In-kernel soft morphology (3-wide min/max pooling, -inf-pad equivalent).
# ---------------------------------------------------------------------------
def _relu(v):
    return jnp.maximum(v, 0.0)


def _neighbors(x, axis, first_mask, last_mask, roll_sign):
    """prev[i] = x[i-1], nxt[i] = x[i+1] along `axis`; out-of-range / seam
    neighbors are replaced by x itself (neutral for min/max pooling)."""
    n = x.shape[axis]
    if n == 1:
        return x, x
    if roll_sign == 0:
        first = jax.lax.slice_in_dim(x, 0, 1, axis=axis)
        last = jax.lax.slice_in_dim(x, n - 1, n, axis=axis)
        prev = jnp.concatenate(
            [first, jax.lax.slice_in_dim(x, 0, n - 1, axis=axis)], axis=axis)
        nxt = jnp.concatenate(
            [jax.lax.slice_in_dim(x, 1, n, axis=axis), last], axis=axis)
    else:
        prev = pltpu.roll(x, roll_sign % n, axis)      # intended jnp.roll(+1)
        nxt = pltpu.roll(x, (-roll_sign) % n, axis)    # intended jnp.roll(-1)
    prev = jnp.where(first_mask, x, prev)
    nxt = jnp.where(last_mask, x, nxt)
    return prev, nxt


def _min3(x, axis, masks, rs):
    prev, nxt = _neighbors(x, axis, masks[axis][0], masks[axis][1], rs)
    return jnp.minimum(jnp.minimum(prev, x), nxt)


def _max3(x, axis, masks, rs):
    prev, nxt = _neighbors(x, axis, masks[axis][0], masks[axis][1], rs)
    return jnp.maximum(jnp.maximum(prev, x), nxt)


def _soft_erode(x, masks, rs):
    # min(-maxpool(-x,(3,1),pad(1,0)), -maxpool(-x,(1,3),pad(0,1)))
    return jnp.minimum(_min3(x, 1, masks, rs), _min3(x, 2, masks, rs))


def _soft_dilate(x, masks, rs):
    # maxpool(x,(3,3),pad(1,1)) -- separable
    return _max3(_max3(x, 1, masks, rs), 2, masks, rs)


def _soft_skel(x, it, masks, rs):
    """clDice soft skeleton with the erosion chain cached:
    e_k = erode^k(x); iteration k uses img = e_k, img1 = dilate(e_{k+1}).
    Total: (it+1) erodes + (it+1) dilates (vs 2*it+1 erodes originally)."""
    e = _soft_erode(x, masks, rs)                       # e_1
    skel = _relu(x - _soft_dilate(e, masks, rs))        # x - open(x)
    for _ in range(it):
        e_next = _soft_erode(e, masks, rs)              # e_{k+1}
        img1 = _soft_dilate(e_next, masks, rs)          # open(e_k)
        delta = _relu(e - img1)
        skel = skel + _relu(delta - skel * delta)
        e = e_next
    return skel


# ---------------------------------------------------------------------------
# Kernel: per-block partial sums, (8, Wp) lane-dense output per grid step.
# ---------------------------------------------------------------------------
def _partial_sums_kernel(pred_ref, true_ref, out_ref, *, roll_sign, img_w,
                         compute_dtype):
    pred_in = pred_ref[...]
    true_in = true_ref[...]
    g, h, wp = pred_in.shape

    pred = pred_in.astype(jnp.float32)
    true = true_in.astype(jnp.float32)

    # Boundary/seam masks, hoisted once and reused by every shift.  Column
    # masks repeat every img_w lanes so rolls never leak across lane-packed
    # images (and zero-padded images stay exactly zero).
    row_i = jax.lax.broadcasted_iota(jnp.int32, (1, h, wp), 1)
    col_i = jax.lax.broadcasted_iota(jnp.int32, (1, h, wp), 2)
    col_m = col_i % img_w
    masks = {1: (row_i == 0, row_i == h - 1),
             2: (col_m == 0, col_m == img_w - 1)}

    # Joint skeletonization of pred and true (single traced pipeline), in
    # bf16 on bf16-VPU parts, f32 elsewhere; reductions stay in f32.
    both = jnp.concatenate([pred_in, true_in], axis=0).astype(compute_dtype)
    skel = _soft_skel(both, ITER, masks, roll_sign).astype(jnp.float32)
    skel_pred = skel[:g]
    skel_true = skel[g:]

    def psum(q):
        # Reduce over (image, row) only; keep the lane axis (cheap, lane-dense).
        return jnp.sum(q, axis=(0, 1), keepdims=True).reshape(1, wp)

    rows = [
        psum(true * pred),        # 0: dice intersection
        psum(pred),               # 1
        psum(true),               # 2
        psum(skel_pred * true),   # 3: tprec numerator
        psum(skel_pred),          # 4: tprec denominator
        psum(skel_true * pred),   # 5: tsens numerator
        psum(skel_true),          # 6: tsens denominator
        jnp.zeros((1, wp), jnp.float32),   # pad to 8 sublanes
    ]
    out_ref[...] = jnp.concatenate(rows, axis=0)[None]


# ---------------------------------------------------------------------------
# Wrapper
# ---------------------------------------------------------------------------
def _choose_blocks(n_imgs, h, wp, cfg, block_images):
    if block_images is not None:
        g = max(1, int(block_images))
    else:
        bytes_per_img = h * wp * 4
        g = max(1, cfg["block_target"] // bytes_per_img)
        g = min(g, n_imgs)
        nblk = -(-n_imgs // g)
        if (cfg["min_blocks"] > 1 and nblk < cfg["min_blocks"]
                and n_imgs >= cfg["min_blocks"]):
            # Guarantee >= 2 grid steps so both v7x TensorCores get work.
            g = -(-n_imgs // cfg["min_blocks"])
    nblk = -(-n_imgs // g)
    return g, nblk


def soft_dice_cldice_loss(y_pred, y_true, *, block_images=None,
                          compute_dtype=None):
    """Forward pass of soft_dice_cldice (iter_=3, alpha=0.2, smooth=1.0).
    Inputs are NCHW; returns a scalar."""
    if y_pred.shape != y_true.shape:
        raise ValueError("y_pred and y_true must have the same shape")
    B, C, H, W = y_pred.shape
    n = B * C
    pred = y_pred.reshape(n, H, W)
    true = y_true.reshape(n, H, W)

    cfg = _device_config()
    if compute_dtype is None:
        compute_dtype = jnp.bfloat16 if cfg["bf16_ok"] else jnp.float32
    compute_dtype = jnp.dtype(compute_dtype)

    # ---- Lane packing: put floor(128/W) images side-by-side along W. ----
    P = max(1, 128 // W) if W < 128 else 1
    if P > 1:
        n_pack = -(-n // P)
        pad = n_pack * P - n
        if pad:
            pred = jnp.concatenate(
                [pred, jnp.zeros((pad, H, W), pred.dtype)], axis=0)
            true = jnp.concatenate(
                [true, jnp.zeros((pad, H, W), true.dtype)], axis=0)
        pred = pred.reshape(n_pack, P, H, W).transpose(0, 2, 1, 3)
        pred = pred.reshape(n_pack, H, P * W)
        true = true.reshape(n_pack, P, H, W).transpose(0, 2, 1, 3)
        true = true.reshape(n_pack, H, P * W)
        n_imgs, Wp = n_pack, P * W
    else:
        n_imgs, Wp = n, W

    # TODO(synk): spatial tiling with halos for huge single images.
    if H * Wp * 4 * 30 > cfg["vmem_limit"]:
        raise NotImplementedError(
            "single image working set too large for VMEM; spatial tiling "
            "is not implemented")

    g, nblk = _choose_blocks(n_imgs, H, Wp, cfg, block_images)

    # Zero-pad the (packed) image axis to a multiple of g (exactly 0
    # contribution to every partial sum), instead of requiring divisibility.
    pad = nblk * g - n_imgs
    if pad:
        pred = jnp.concatenate(
            [pred, jnp.zeros((pad, H, Wp), pred.dtype)], axis=0)
        true = jnp.concatenate(
            [true, jnp.zeros((pad, H, Wp), true.dtype)], axis=0)

    roll_sign = _get_roll_sign(compute_dtype)
    kernel = functools.partial(_partial_sums_kernel, roll_sign=roll_sign,
                               img_w=W, compute_dtype=compute_dtype)

    sums = pl.pallas_call(
        kernel,
        out_shape=jax.ShapeDtypeStruct((nblk, 8, Wp), jnp.float32),
        grid=(nblk,),
        in_specs=[
            pl.BlockSpec((g, H, Wp), lambda i: (i, 0, 0)),
            pl.BlockSpec((g, H, Wp), lambda i: (i, 0, 0)),
        ],
        out_specs=pl.BlockSpec((1, 8, Wp), lambda i: (i, 0, 0)),
        compiler_params=pltpu.CompilerParams(
            dimension_semantics=("parallel",),
            vmem_limit_bytes=cfg["vmem_limit"],
        ),
    )(pred, true)

    s = jnp.sum(sums, axis=(0, 2))                    # (8,)
    inter, sum_pred, sum_true = s[0], s[1], s[2]
    sp_t, sp, st_p, st = s[3], s[4], s[5], s[6]

    dice = 1.0 - (2.0 * inter + 1.0) / (sum_true + sum_pred + 1.0)
    tprec = (sp_t + SMOOTH) / (sp + SMOOTH)
    tsens = (st_p + SMOOTH) / (st + SMOOTH)
    cl_dice = 1.0 - 2.0 * (tprec * tsens) / (tprec + tsens)
    return (1.0 - ALPHA) * dice + ALPHA * cl_dice


# ----------------------- pure-JAX reference (NCHW) -----------------------
def _erode_ref(x):
    p1 = -jax.lax.reduce_window(-x, -jnp.inf, jax.lax.max, (1, 1, 3, 1),
                                (1, 1, 1, 1),
                                [(0, 0), (0, 0), (1, 1), (0, 0)])
    p2 = -jax.lax.reduce_window(-x, -jnp.inf, jax.lax.max, (1, 1, 1, 3),
                                (1, 1, 1, 1),
                                [(0, 0), (0, 0), (0, 0), (1, 1)])
    return jnp.minimum(p1, p2)


def _dilate_ref(x):
    return jax.lax.reduce_window(x, -jnp.inf, jax.lax.max, (1, 1, 3, 3),
                                 (1, 1, 1, 1),
                                 [(0, 0), (0, 0), (1, 1), (1, 1)])


def _skel_ref(x, it):
    img1 = _dilate_ref(_erode_ref(x))
    skel = jnp.maximum(x - img1, 0.0)
    img = x
    for _ in range(it):
        img = _erode_ref(img)
        img1 = _dilate_ref(_erode_ref(img))
        delta = jnp.maximum(img - img1, 0.0)
        skel = skel + jnp.maximum(delta - skel * delta, 0.0)
    return skel


def _loss_ref(y_pred, y_true):
    inter = jnp.sum(y_true * y_pred)
    dice = 1.0 - (2.0 * inter + 1.0) / (jnp.sum(y_true) + jnp.sum(y_pred) + 1.0)
    sp = _skel_ref(y_pred, ITER)
    st = _skel_ref(y_true, ITER)
    tprec = (jnp.sum(sp * y_true) + SMOOTH) / (jnp.sum(sp) + SMOOTH)
    tsens = (jnp.sum(st * y_pred) + SMOOTH) / (jnp.sum(st) + SMOOTH)
    cl_dice = 1.0 - 2.0 * (tprec * tsens) / (tprec + tsens)
    return (1.0 - ALPHA) * dice + ALPHA * cl_dice


if __name__ == "__main__":
    key = jax.random.PRNGKey(0)
    k1, k2, k3, k4 = jax.random.split(key, 4)

    # Case 1: the module's nominal small shape (probability-like maps).
    B, C, H, W = 2, 4, 16, 16
    y_pred = jax.random.uniform(k1, (B, C, H, W), dtype=jnp.float32)
    y_true = (jax.random.uniform(k2, (B, C, H, W)) > 0.5).astype(jnp.float32)
    ref1 = jax.block_until_ready(_loss_ref(y_pred, y_true))

    # Exact check with the f32 skeleton path.
    loss_f32 = jax.block_until_ready(
        soft_dice_cldice_loss(y_pred, y_true, compute_dtype=jnp.float32))
    assert jnp.allclose(loss_f32, ref1, atol=3e-5, rtol=1e-5), (loss_f32, ref1)

    # Auto path (bf16 skeleton on v6e/v7x, f32 elsewhere) -> looser tolerance.
    loss_auto = jax.block_until_ready(soft_dice_cldice_loss(y_pred, y_true))
    assert jnp.allclose(loss_auto, ref1, atol=2e-2, rtol=5e-2), (loss_auto, ref1)

    # Case 2: W that does not divide 128, B*C not a multiple of the packing
    # factor, and a forced multi-block grid (exercises seam masks, zero
    # padding at both the pack and block stages, and the pipelined grid).
    B2, C2, H2, W2 = 2, 4, 16, 24
    y_pred2 = jax.random.uniform(k3, (B2, C2, H2, W2), dtype=jnp.float32)
    y_true2 = (jax.random.uniform(k4, (B2, C2, H2, W2)) > 0.5).astype(jnp.float32)
    ref2 = jax.block_until_ready(_loss_ref(y_pred2, y_true2))
    loss2 = jax.block_until_ready(
        soft_dice_cldice_loss(y_pred2, y_true2, block_images=1,
                              compute_dtype=jnp.float32))
    assert jnp.allclose(loss2, ref2, atol=3e-5, rtol=1e-5), (loss2, ref2)

    print("KERNEL_OK")
</pallas_src>

<mosaic_0001>
module attributes {stable_mosaic.version = 11 : i64} {
  func.func @probe_kernel(%arg0: memref<2x8x128xf32, #tpu.memory_space<vmem>>, %arg1: memref<2x8x128xf32, #tpu.memory_space<vmem>>) attributes {dimension_semantics = [], scalar_prefetch = 0 : i64, scratch_operands = 0 : i64, tpu.core_type = #tpu.core_type<tc>} {
    %c0 = arith.constant 0 : index
    %c0_0 = arith.constant 0 : index
    %c0_1 = arith.constant 0 : index
    %0 = vector.load %arg0[%c0, %c0_0, %c0_1] : memref<2x8x128xf32, #tpu.memory_space<vmem>>, vector<2x8x128xf32>
    %c1_i32 = arith.constant 1 : i32
    %1 = tpu.dynamic_rotate %0 by %c1_i32 dim 1 : vector<2x8x128xf32>, i32 -> vector<2x8x128xf32>
    %c1_i32_2 = arith.constant 1 : i32
    %2 = tpu.dynamic_rotate %0 by %c1_i32_2 dim 2 : vector<2x8x128xf32>, i32 -> vector<2x8x128xf32>
    %cst = arith.constant 2.000000e+00 : f32
    %3 = vector.broadcast %cst : f32 to vector<2x8x128xf32>
    %4 = arith.mulf %3, %2 : vector<2x8x128xf32>
    %5 = arith.addf %1, %4 : vector<2x8x128xf32>
    %c0_3 = arith.constant 0 : index
    %c0_4 = arith.constant 0 : index
    %c0_5 = arith.constant 0 : index
    %6 = vector.load %arg1[%c0_3, %c0_4, %c0_5] : memref<2x8x128xf32, #tpu.memory_space<vmem>>, vector<2x8x128xf32>
    tpu.vector_store %arg1[%c0_3, %c0_4, %c0_5], %5 {strides = array<i32>} : memref<2x8x128xf32, #tpu.memory_space<vmem>>, vector<2x8x128xf32>,
    return
  }
}

module attributes {stable_mosaic.version = 11 : i64} {
  func.func @_partial_sums_kernel(%arg0: i32, %arg1: memref<1x16x128xf32, #tpu.memory_space<vmem>>, %arg2: memref<1x16x128xf32, #tpu.memory_space<vmem>>, %arg3: memref<1x8x128xf32, #tpu.memory_space<vmem>>) attributes {dimension_semantics = [#tpu.dimension_semantics<parallel>], iteration_bounds = array<i64: 1>, scalar_prefetch = 0 : i64, scratch_operands = 0 : i64, tpu.core_type = #tpu.core_type<tc>, window_params = [{transform_indices = @transform_0, window_bounds = array<i64: 1, 16, 128>}, {transform_indices = @transform_1, window_bounds = array<i64: 1, 16, 128>}, {transform_indices = @transform_2, window_bounds = array<i64: 1, 8, 128>}]} {
    %c0 = arith.constant 0 : index
    %c0_0 = arith.constant 0 : index
    %c0_1 = arith.constant 0 : index
    %0 = vector.load %arg1[%c0, %c0_0, %c0_1] : memref<1x16x128xf32, #tpu.memory_space<vmem>>, vector<1x16x128xf32>
    %c0_2 = arith.constant 0 : index
    %c0_3 = arith.constant 0 : index
    %c0_4 = arith.constant 0 : index
    %1 = vector.load %arg2[%c0_2, %c0_3, %c0_4] : memref<1x16x128xf32, #tpu.memory_space<vmem>>, vector<1x16x128xf32>
    %2 = tpu.iota {dimensions = array<i32: 1>} : vector<1x16x128xi32>
    %3 = tpu.iota {dimensions = array<i32: 2>} : vector<1x16x128xi32>
    %c16_i32 = arith.constant 16 : i32
    %c0_i32 = arith.constant 0 : i32
    %4 = arith.cmpi eq, %c16_i32, %c0_i32 : i32
    %c1_i32 = arith.constant 1 : i32
    %5 = arith.select %4, %c1_i32, %c16_i32 : i32
    %6 = vector.broadcast %5 : i32 to vector<1x16x128xi32>
    %7 = arith.remsi %3, %6 : vector<1x16x128xi32>
    %c0_i32_5 = arith.constant 0 : i32
    %8 = vector.broadcast %c0_i32_5 : i32 to vector<1x16x128xi32>
    %9 = arith.cmpi ne, %7, %8 : vector<1x16x128xi32>
    %c0_i32_6 = arith.constant 0 : i32
    %10 = vector.broadcast %c0_i32_6 : i32 to vector<1x16x128xi32>
    %11 = arith.cmpi slt, %7, %10 : vector<1x16x128xi32>
    %c0_i32_7 = arith.constant 0 : i32
    %12 = arith.cmpi slt, %5, %c0_i32_7 : i32
    %13 = vector.broadcast %12 : i1 to vector<1x16x128xi1>
    %14 = vector.broadcast %13 : vector<1x16x128xi1> to vector<1x16x128xi1>
    %15 = arith.xori %11, %14 : vector<1x16x128xi1>
    %16 = arith.andi %15, %9 : vector<1x16x128xi1>
    %17 = vector.broadcast %5 : i32 to vector<1x16x128xi32>
    %18 = arith.addi %7, %17 : vector<1x16x128xi32>
    %19 = arith.select %16, %18, %7 : vector<1x16x128xi1>, vector<1x16x128xi32>
    %c0_i32_8 = arith.constant 0 : i32
    %20 = vector.broadcast %c0_i32_8 : i32 to vector<1x16x128xi32>
    %21 = arith.cmpi eq, %2, %20 : vector<1x16x128xi32>
    %c15_i32 = arith.constant 15 : i32
    %22 = vector.broadcast %c15_i32 : i32 to vector<1x16x128xi32>
    %23 = arith.cmpi eq, %2, %22 : vector<1x16x128xi32>
    %c0_i32_9 = arith.constant 0 : i32
    %24 = vector.broadcast %c0_i32_9 : i32 to vector<1x16x128xi32>
    %25 = arith.cmpi eq, %19, %24 : vector<1x16x128xi32>
    %c15_i32_10 = arith.constant 15 : i32
    %26 = vector.broadcast %c15_i32_10 : i32 to vector<1x16x128xi32>
    %27 = arith.cmpi eq, %19, %26 : vector<1x16x128xi32>
    %28 = tpu.concatenate %0, %1 in 0 : vector<1x16x128xf32>, vector<1x16x128xf32> -> vector<2x16x128xf32>
    %29 = vector.extract_strided_slice %28 {offsets = [0, 0, 0], sizes = [2, 1, 128], strides = [1, 1, 1]} : vector<2x16x128xf32> to vector<2x1x128xf32>
    %30 = vector.extract_strided_slice %28 {offsets = [0, 15, 0], sizes = [2, 1, 128], strides = [1, 1, 1]} : vector<2x16x128xf32> to vector<2x1x128xf32>
    %31 = vector.extract_strided_slice %28 {offsets = [0, 0, 0], sizes = [2, 15, 128], strides = [1, 1, 1]} : vector<2x16x128xf32> to vector<2x15x128xf32>
    %32 = tpu.concatenate %29, %31 in 1 : vector<2x1x128xf32>, vector<2x15x128xf32> -> vector<2x16x128xf32>
    %33 = vector.extract_strided_slice %28 {offsets = [0, 1, 0], sizes = [2, 15, 128], strides = [1, 1, 1]} : vector<2x16x128xf32> to vector<2x15x128xf32>
    %34 = tpu.concatenate %33, %30 in 1 : vector<2x15x128xf32>, vector<2x1x128xf32> -> vector<2x16x128xf32>
    %35 = vector.shape_cast %21 : vector<1x16x128xi1> to vector<1x16x128xi1>
    %36 = vector.broadcast %35 : vector<1x16x128xi1> to vector<2x16x128xi1>
    %37 = arith.select %36, %28, %32 : vector<2x16x128xi1>, vector<2x16x128xf32>
    %38 = vector.shape_cast %23 : vector<1x16x128xi1> to vector<1x16x128xi1>
    %39 = vector.broadcast %38 : vector<1x16x128xi1> to vector<2x16x128xi1>
    %40 = arith.select %39, %28, %34 : vector<2x16x128xi1>, vector<2x16x128xf32>
    %41 = arith.minimumf %37, %28 : vector<2x16x128xf32>
    %42 = arith.minimumf %41, %40 : vector<2x16x128xf32>
    %43 = vector.extract_strided_slice %28 {offsets = [0, 0, 0], sizes = [2, 16, 1], strides = [1, 1, 1]} : vector<2x16x128xf32> to vector<2x16x1xf32>
    %44 = vector.extract_strided_slice %28 {offsets = [0, 0, 127], sizes = [2, 16, 1], strides = [1, 1, 1]} : vector<2x16x128xf32> to vector<2x16x1xf32>
    %45 = vector.extract_strided_slice %28 {offsets = [0, 0, 0], sizes = [2, 16, 127], strides = [1, 1, 1]} : vector<2x16x128xf32> to vector<2x16x127xf32>
    %46 = tpu.concatenate %43, %45 in 2 : vector<2x16x1xf32>, vector<2x16x127xf32> -> vector<2x16x128xf32>
    %47 = vector.extract_strided_slice %28 {offsets = [0, 0, 1], sizes = [2, 16, 127], strides = [1, 1, 1]} : vector<2x16x128xf32> to vector<2x16x127xf32>
    %48 = tpu.concatenate %47, %44 in 2 : vector<2x16x127xf32>, vector<2x16x1xf32> -> vector<2x16x128xf32>
    %49 = vector.shape_cast %25 : vector<1x16x128xi1> to vector<1x16x128xi1>
    %50 = vector.broadcast %49 : vector<1x16x128xi1> to vector<2x16x128xi1>
    %51 = arith.select %50, %28, %46 : vector<2x16x128xi1>, vector<2x16x128xf32>
    %52 = vector.shape_cast %27 : vector<1x16x128xi1> to vector<1x16x128xi1>
    %53 = vector.broadcast %52 : vector<1x16x128xi1> to vector<2x16x128xi1>
    %54 = arith.select %53, %28, %48 : vector<2x16x128xi1>, vector<2x16x128xf32>
    %55 = arith.minimumf %51, %28 : vector<2x16x128xf32>
    %56 = arith.minimumf %55, %54 : vector<2x16x128xf32>
    %57 = arith.minimumf %42, %56 : vector<2x16x128xf32>
    %58 = vector.extract_strided_slice %57 {offsets = [0, 0, 0], sizes = [2, 1, 128], strides = [1, 1, 1]} : vector<2x16x128xf32> to vector<2x1x128xf32>
    %59 = vector.extract_strided_slice %57 {offsets = [0, 15, 0], sizes = [2, 1, 128], strides = [1, 1, 1]} : vector<2x16x128xf32> to vector<2x1x128xf32>
    %60 = vector.extract_strided_slice %57 {offsets = [0, 0, 0], sizes = [2, 15, 128], strides = [1, 1, 1]} : vector<2x16x128xf32> to vector<2x15x128xf32>
    %61 = tpu.concatenate %58, %60 in 1 : vector<2x1x128xf32>, vector<2x15x128xf32> -> vector<2x16x128xf32>
    %62 = vector.extract_strided_slice %57 {offsets = [0, 1, 0], sizes = [2, 15, 128], strides = [1, 1, 1]} : vector<2x16x128xf32> to vector<2x15x128xf32>
    %63 = tpu.concatenate %62, %59 in 1 : vector<2x15x128xf32>, vector<2x1x128xf32> -> vector<2x16x128xf32>
    %64 = vector.shape_cast %21 : vector<1x16x128xi1> to vector<1x16x128xi1>
    %65 = vector.broadcast %64 : vector<1x16x128xi1> to vector<2x16x128xi1>
    %66 = arith.select %65, %57, %61 : vector<2x16x128xi1>, vector<2x16x128xf32>
    %67 = vector.shape_cast %23 : vector<1x16x128xi1> to vector<1x16x128xi1>
    %68 = vector.broadcast %67 : vector<1x16x128xi1> to vector<2x16x128xi1>
    %69 = arith.select %68, %57, %63 : vector<2x16x128xi1>, vector<2x16x128xf32>
    %70 = arith.maximumf %66, %57 : vector<2x16x128xf32>
    %71 = arith.maximumf %70, %69 : vector<2x16x128xf32>
    %72 = vector.extract_strided_slice %71 {offsets = [0, 0, 0], sizes = [2, 16, 1], strides = [1, 1, 1]} : vector<2x16x128xf32> to vector<2x16x1xf32>
    %73 = vector.extract_strided_slice %71 {offsets = [0, 0, 127], sizes = [2, 16, 1], strides = [1, 1, 1]} : vector<2x16x128xf32> to vector<2x16x1xf32>
    %74 = vector.extract_strided_slice %71 {offsets = [0, 0, 0], sizes = [2, 16, 127], strides = [1, 1, 1]} : vector<2x16x128xf32> to vector<2x16x127xf32>
    %75 = tpu.concatenate %72, %74 in 2 : vector<2x16x1xf32>, vector<2x16x127xf32> -> vector<2x16x128xf32>
    %76 = vector.extract_strided_slice %71 {offsets = [0, 0, 1], sizes = [2, 16, 127], strides = [1, 1, 1]} : vector<2x16x128xf32> to vector<2x16x127xf32>
    %77 = tpu.concatenate %76, %73 in 2 : vector<2x16x127xf32>, vector<2x16x1xf32> -> vector<2x16x128xf32>
    %78 = vector.shape_cast %25 : vector<1x16x128xi1> to vector<1x16x128xi1>
    %79 = vector.broadcast %78 : vector<1x16x128xi1> to vector<2x16x128xi1>
    %80 = arith.select %79, %71, %75 : vector<2x16x128xi1>, vector<2x16x128xf32>
    %81 = vector.shape_cast %27 : vector<1x16x128xi1> to vector<1x16x128xi1>
    %82 = vector.broadcast %81 : vector<1x16x128xi1> to vector<2x16x128xi1>
    %83 = arith.select %82, %71, %77 : vector<2x16x128xi1>, vector<2x16x128xf32>
    %84 = arith.maximumf %80, %71 : vector<2x16x128xf32>
    %85 = arith.maximumf %84, %83 : vector<2x16x128xf32>
    %86 = arith.subf %28, %85 : vector<2x16x128xf32>
    %cst = arith.constant 0.000000e+00 : f32
    %87 = vector.broadcast %cst : f32 to vector<2x16x128xf32>
    %88 = arith.maximumf %86, %87 : vector<2x16x128xf32>
    %89 = vector.extract_strided_slice %57 {offsets = [0, 0, 0], sizes = [2, 1, 128], strides = [1, 1, 1]} : vector<2x16x128xf32> to vector<2x1x128xf32>
    %90 = vector.extract_strided_slice %57 {offsets = [0, 15, 0], sizes = [2, 1, 128], strides = [1, 1, 1]} : vector<2x16x128xf32> to vector<2x1x128xf32>
    %91 = vector.extract_strided_slice %57 {offsets = [0, 0, 0], sizes = [2, 15, 128], strides = [1, 1, 1]} : vector<2x16x128xf32> to vector<2x15x128xf32>
    %92 = tpu.concatenate %89, %91 in 1 : vector<2x1x128xf32>, vector<2x15x128xf32> -> vector<2x16x128xf32>
    %93 = vector.extract_strided_slice %57 {offsets = [0, 1, 0], sizes = [2, 15, 128], strides = [1, 1, 1]} : vector<2x16x128xf32> to vector<2x15x128xf32>
    %94 = tpu.concatenate %93, %90 in 1 : vector<2x15x128xf32>, vector<2x1x128xf32> -> vector<2x16x128xf32>
    %95 = vector.shape_cast %21 : vector<1x16x128xi1> to vector<1x16x128xi1>
    %96 = vector.broadcast %95 : vector<1x16x128xi1> to vector<2x16x128xi1>
    %97 = arith.select %96, %57, %92 : vector<2x16x128xi1>, vector<2x16x128xf32>
    %98 = vector.shape_cast %23 : vector<1x16x128xi1> to vector<1x16x128xi1>
    %99 = vector.broadcast %98 : vector<1x16x128xi1> to vector<2x16x128xi1>
    %100 = arith.select %99, %57, %94 : vector<2x16x128xi1>, vector<2x16x128xf32>
    %101 = arith.minimumf %97, %57 : vector<2x16x128xf32>
    %102 = arith.minimumf %101, %100 : vector<2x16x128xf32>
    %103 = vector.extract_strided_slice %57 {offsets = [0, 0, 0], sizes = [2, 16, 1], strides = [1, 1, 1]} : vector<2x16x128xf32> to vector<2x16x1xf32>
    %104 = vector.extract_strided_slice %57 {offsets = [0, 0, 127], sizes = [2, 16, 1], strides = [1, 1, 1]} : vector<2x16x128xf32> to vector<2x16x1xf32>
    %105 = vector.extract_strided_slice %57 {offsets = [0, 0, 0], sizes = [2, 16, 127], strides = [1, 1, 1]} : vector<2x16x128xf32> to vector<2x16x127xf32>
    %106 = tpu.concatenate %103, %105 in 2 : vector<2x16x1xf32>, vector<2x16x127xf32> -> vector<2x16x128xf32>
    %107 = vector.extract_strided_slice %57 {offsets = [0, 0, 1], sizes = [2, 16, 127], strides = [1, 1, 1]} : vector<2x16x128xf32> to vector<2x16x127xf32>
    %108 = tpu.concatenate %107, %104 in 2 : vector<2x16x127xf32>, vector<2x16x1xf32> -> vector<2x16x128xf32>
    %109 = vector.shape_cast %25 : vector<1x16x128xi1> to vector<1x16x128xi1>
    %110 = vector.broadcast %109 : vector<1x16x128xi1> to vector<2x16x128xi1>
    %111 = arith.select %110, %57, %106 : vector<2x16x128xi1>, vector<2x16x128xf32>
    %112 = vector.shape_cast %27 : vector<1x16x128xi1> to vector<1x16x128xi1>
    %113 = vector.broadcast %112 : vector<1x16x128xi1> to vector<2x16x128xi1>
    %114 = arith.select %113, %57, %108 : vector<2x16x128xi1>, vector<2x16x128xf32>
    %115 = arith.minimumf %111, %57 : vector<2x16x128xf32>
    %116 = arith.minimumf %115, %114 : vector<2x16x128xf32>
    %117 = arith.minimumf %102, %116 : vector<2x16x128xf32>
    %118 = vector.extract_strided_slice %117 {offsets = [0, 0, 0], sizes = [2, 1, 128], strides = [1, 1, 1]} : vector<2x16x128xf32> to vector<2x1x128xf32>
    %119 = vector.extract_strided_slice %117 {offsets = [0, 15, 0], sizes = [2, 1, 128], strides = [1, 1, 1]} : vector<2x16x128xf32> to vector<2x1x128xf32>
    %120 = vector.extract_strided_slice %117 {offsets = [0, 0, 0], sizes = [2, 15, 128], strides = [1, 1, 1]} : vector<2x16x128xf32> to vector<2x15x128xf32>
    %121 = tpu.concatenate %118, %120 in 1 : vector<2x1x128xf32>, vector<2x15x128xf32> -> vector<2x16x128xf32>
    %122 = vector.extract_strided_slice %117 {offsets = [0, 1, 0], sizes = [2, 15, 128], strides = [1, 1, 1]} : vector<2x16x128xf32> to vector<2x15x128xf32>
    %123 = tpu.concatenate %122, %119 in 1 : vector<2x15x128xf32>, vector<2x1x128xf32> -> vector<2x16x128xf32>
    %124 = vector.shape_cast %21 : vector<1x16x128xi1> to vector<1x16x128xi1>
    %125 = vector.broadcast %124 : vector<1x16x128xi1> to vector<2x16x128xi1>
    %126 = arith.select %125, %117, %121 : vector<2x16x128xi1>, vector<2x16x128xf32>
    %127 = vector.shape_cast %23 : vector<1x16x128xi1> to vector<1x16x128xi1>
    %128 = vector.broadcast %127 : vector<1x16x128xi1> to vector<2x16x128xi1>
    %129 = arith.select %128, %117, %123 : vector<2x16x128xi1>, vector<2x16x128xf32>
    %130 = arith.maximumf %126, %117 : vector<2x16x128xf32>
    %131 = arith.maximumf %130, %129 : vector<2x16x128xf32>
    %132 = vector.extract_strided_slice %131 {offsets = [0, 0, 0], sizes = [2, 16, 1], strides = [1, 1, 1]} : vector<2x16x128xf32> to vector<2x16x1xf32>
    %133 = vector.extract_strided_slice %131 {offsets = [0, 0, 127], sizes = [2, 16, 1], strides = [1, 1, 1]} : vector<2x16x128xf32> to vector<2x16x1xf32>
    %134 = vector.extract_strided_slice %131 {offsets = [0, 0, 0], sizes = [2, 16, 127], strides = [1, 1, 1]} : vector<2x16x128xf32> to vector<2x16x127xf32>
    %135 = tpu.concatenate %132, %134 in 2 : vector<2x16x1xf32>, vector<2x16x127xf32> -> vector<2x16x128xf32>
    %136 = vector.extract_strided_slice %131 {offsets = [0, 0, 1], sizes = [2, 16, 127], strides = [1, 1, 1]} : vector<2x16x128xf32> to vector<2x16x127xf32>
    %137 = tpu.concatenate %136, %133 in 2 : vector<2x16x127xf32>, vector<2x16x1xf32> -> vector<2x16x128xf32>
    %138 = vector.shape_cast %25 : vector<1x16x128xi1> to vector<1x16x128xi1>
    %139 = vector.broadcast %138 : vector<1x16x128xi1> to vector<2x16x128xi1>
    %140 = arith.select %139, %131, %135 : vector<2x16x128xi1>, vector<2x16x128xf32>
    %141 = vector.shape_cast %27 : vector<1x16x128xi1> to vector<1x16x128xi1>
    %142 = vector.broadcast %141 : vector<1x16x128xi1> to vector<2x16x128xi1>
    %143 = arith.select %142, %131, %137 : vector<2x16x128xi1>, vector<2x16x128xf32>
    %144 = arith.maximumf %140, %131 : vector<2x16x128xf32>
    %145 = arith.maximumf %144, %143 : vector<2x16x128xf32>
    %146 = arith.subf %57, %145 : vector<2x16x128xf32>
    %cst_11 = arith.constant 0.000000e+00 : f32
    %147 = vector.broadcast %cst_11 : f32 to vector<2x16x128xf32>
    %148 = arith.maximumf %146, %147 : vector<2x16x128xf32>
    %149 = arith.mulf %88, %148 : vector<2x16x128xf32>
    %150 = arith.subf %148, %149 : vector<2x16x128xf32>
    %cst_12 = arith.constant 0.000000e+00 : f32
    %151 = vector.broadcast %cst_12 : f32 to vector<2x16x128xf32>
    %152 = arith.maximumf %150, %151 : vector<2x16x128xf32>
    %153 = arith.addf %88, %152 : vector<2x16x128xf32>
    %154 = vector.extract_strided_slice %117 {offsets = [0, 0, 0], sizes = [2, 1, 128], strides = [1, 1, 1]} : vector<2x16x128xf32> to vector<2x1x128xf32>
    %155 = vector.extract_strided_slice %117 {offsets = [0, 15, 0], sizes = [2, 1, 128], strides = [1, 1, 1]} : vector<2x16x128xf32> to vector<2x1x128xf32>
    %156 = vector.extract_strided_slice %117 {offsets = [0, 0, 0], sizes = [2, 15, 128], strides = [1, 1, 1]} : vector<2x16x128xf32> to vector<2x15x128xf32>
    %157 = tpu.concatenate %154, %156 in 1 : vector<2x1x128xf32>, vector<2x15x128xf32> -> vector<2x16x128xf32>
    %158 = vector.extract_strided_slice %117 {offsets = [0, 1, 0], sizes = [2, 15, 128], strides = [1, 1, 1]} : vector<2x16x128xf32> to vector<2x15x128xf32>
    %159 = tpu.concatenate %158, %155 in 1 : vector<2x15x128xf32>, vector<2x1x128xf32> -> vector<2x16x128xf32>
    %160 = vector.shape_cast %21 : vector<1x16x128xi1> to vector<1x16x128xi1>
    %161 = vector.broadcast %160 : vector<1x16x128xi1> to vector<2x16x128xi1>
    %162 = arith.select %161, %117, %157 : vector<2x16x128xi1>, vector<2x16x128xf32>
    %163 = vector.shape_cast %23 : vector<1x16x128xi1> to vector<1x16x128xi1>
    %164 = vector.broadcast %163 : vector<1x16x128xi1> to vector<2x16x128xi1>
    %165 = arith.select %164, %117, %159 : vector<2x16x128xi1>, vector<2x16x128xf32>
    %166 = arith.minimumf %162, %117 : vector<2x16x128xf32>
    %167 = arith.minimumf %166, %165 : vector<2x16x128xf32>
    %168 = vector.extract_strided_slice %117 {offsets = [0, 0, 0], sizes = [2, 16, 1], strides = [1, 1, 1]} : vector<2x16x128xf32> to vector<2x16x1xf32>
    %169 = vector.extract_strided_slice %117 {offsets = [0, 0, 127], sizes = [2, 16, 1], strides = [1, 1, 1]} : vector<2x16x128xf32> to vector<2x16x1xf32>
    %170 = vector.extract_strided_slice %117 {offsets = [0, 0, 0], sizes = [2, 16, 127], strides = [1, 1, 1]} : vector<2x16x128xf32> to vector<2x16x127xf32>
    %171 = tpu.concatenate %168, %170 in 2 : vector<2x16x1xf32>, vector<2x16x127xf32> -> vector<2x16x128xf32>
    %172 = vector.extract_strided_slice %117 {offsets = [0, 0, 1], sizes = [2, 16, 127], strides = [1, 1, 1]} : vector<2x16x128xf32> to vector<2x16x127xf32>
    %173 = tpu.concatenate %172, %169 in 2 : vector<2x16x127xf32>, vector<2x16x1xf32> -> vector<2x16x128xf32>
    %174 = vector.shape_cast %25 : vector<1x16x128xi1> to vector<1x16x128xi1>
    %175 = vector.broadcast %174 : vector<1x16x128xi1> to vector<2x16x128xi1>
    %176 = arith.select %175, %117, %171 : vector<2x16x128xi1>, vector<2x16x128xf32>
    %177 = vector.shape_cast %27 : vector<1x16x128xi1> to vector<1x16x128xi1>
    %178 = vector.broadcast %177 : vector<1x16x128xi1> to vector<2x16x128xi1>
    %179 = arith.select %178, %117, %173 : vector<2x16x128xi1>, vector<2x16x128xf32>
    %180 = arith.minimumf %176, %117 : vector<2x16x128xf32>
    %181 = arith.minimumf %180, %179 : vector<2x16x128xf32>
    %182 = arith.minimumf %167, %181 : vector<2x16x128xf32>
    %183 = vector.extract_strided_slice %182 {offsets = [0, 0, 0], sizes = [2, 1, 128], strides = [1, 1, 1]} : vector<2x16x128xf32> to vector<2x1x128xf32>
    %184 = vector.extract_strided_slice %182 {offsets = [0, 15, 0], sizes = [2, 1, 128], strides = [1, 1, 1]} : vector<2x16x128xf32> to vector<2x1x128xf32>
    %185 = vector.extract_strided_slice %182 {offsets = [0, 0, 0], sizes = [2, 15, 128], strides = [1, 1, 1]} : vector<2x16x128xf32> to vector<2x15x128xf32>
    %186 = tpu.concatenate %183, %185 in 1 : vector<2x1x128xf32>, vector<2x15x128xf32> -> vector<2x16x128xf32>
    %187 = vector.extract_strided_slice %182 {offsets = [0, 1, 0], sizes = [2, 15, 128], strides = [1, 1, 1]} : vector<2x16x128xf32> to vector<2x15x128xf32>
    %188 = tpu.concatenate %187, %184 in 1 : vector<2x15x128xf32>, vector<2x1x128xf32> -> vector<2x16x128xf32>
    %189 = vector.shape_cast %21 : vector<1x16x128xi1> to vector<1x16x128xi1>
    %190 = vector.broadcast %189 : vector<1x16x128xi1> to vector<2x16x128xi1>
    %191 = arith.select %190, %182, %186 : vector<2x16x128xi1>, vector<2x16x128xf32>
    %192 = vector.shape_cast %23 : vector<1x16x128xi1> to vector<1x16x128xi1>
    %193 = vector.broadcast %192 : vector<1x16x128xi1> to vector<2x16x128xi1>
    %194 = arith.select %193, %182, %188 : vector<2x16x128xi1>, vector<2x16x128xf32>
    %195 = arith.maximumf %191, %182 : vector<2x16x128xf32>
    %196 = arith.maximumf %195, %194 : vector<2x16x128xf32>
    %197 = vector.extract_strided_slice %196 {offsets = [0, 0, 0], sizes = [2, 16, 1], strides = [1, 1, 1]} : vector<2x16x128xf32> to vector<2x16x1xf32>
    %198 = vector.extract_strided_slice %196 {offsets = [0, 0, 127], sizes = [2, 16, 1], strides = [1, 1, 1]} : vector<2x16x128xf32> to vector<2x16x1xf32>
    %199 = vector.extract_strided_slice %196 {offsets = [0, 0, 0], sizes = [2, 16, 127], strides = [1, 1, 1]} : vector<2x16x128xf32> to vector<2x16x127xf32>
    %200 = tpu.concatenate %197, %199 in 2 : vector<2x16x1xf32>, vector<2x16x127xf32> -> vector<2x16x128xf32>
    %201 = vector.extract_strided_slice %196 {offsets = [0, 0, 1], sizes = [2, 16, 127], strides = [1, 1, 1]} : vector<2x16x128xf32> to vector<2x16x127xf32>
    %202 = tpu.concatenate %201, %198 in 2 : vector<2x16x127xf32>, vector<2x16x1xf32> -> vector<2x16x128xf32>
    %203 = vector.shape_cast %25 : vector<1x16x128xi1> to vector<1x16x128xi1>
    %204 = vector.broadcast %203 : vector<1x16x128xi1> to vector<2x16x128xi1>
    %205 = arith.select %204, %196, %200 : vector<2x16x128xi1>, vector<2x16x128xf32>
    %206 = vector.shape_cast %27 : vector<1x16x128xi1> to vector<1x16x128xi1>
    %207 = vector.broadcast %206 : vector<1x16x128xi1> to vector<2x16x128xi1>
    %208 = arith.select %207, %196, %202 : vector<2x16x128xi1>, vector<2x16x128xf32>
    %209 = arith.maximumf %205, %196 : vector<2x16x128xf32>
    %210 = arith.maximumf %209, %208 : vector<2x16x128xf32>
    %211 = arith.subf %117, %210 : vector<2x16x128xf32>
    %cst_13 = arith.constant 0.000000e+00 : f32
    %212 = vector.broadcast %cst_13 : f32 to vector<2x16x128xf32>
    %213 = arith.maximumf %211, %212 : vector<2x16x128xf32>
    %214 = arith.mulf %153, %213 : vector<2x16x128xf32>
    %215 = arith.subf %213, %214 : vector<2x16x128xf32>
    %cst_14 = arith.constant 0.000000e+00 : f32
    %216 = vector.broadcast %cst_14 : f32 to vector<2x16x128xf32>
    %217 = arith.maximumf %215, %216 : vector<2x16x128xf32>
    %218 = arith.addf %153, %217 : vector<2x16x128xf32>
    %219 = vector.extract_strided_slice %182 {offsets = [0, 0, 0], sizes = [2, 1, 128], strides = [1, 1, 1]} : vector<2x16x128xf32> to vector<2x1x128xf32>
    %220 = vector.extract_strided_slice %182 {offsets = [0, 15, 0], sizes = [2, 1, 128], strides = [1, 1, 1]} : vector<2x16x128xf32> to vector<2x1x128xf32>
    %221 = vector.extract_strided_slice %182 {offsets = [0, 0, 0], sizes = [2, 15, 128], strides = [1, 1, 1]} : vector<2x16x128xf32> to vector<2x15x128xf32>
    %222 = tpu.concatenate %219, %221 in 1 : vector<2x1x128xf32>, vector<2x15x128xf32> -> vector<2x16x128xf32>
    %223 = vector.extract_strided_slice %182 {offsets = [0, 1, 0], sizes = [2, 15, 128], strides = [1, 1, 1]} : vector<2x16x128xf32> to vector<2x15x128xf32>
    %224 = tpu.concatenate %223, %220 in 1 : vector<2x15x128xf32>, vector<2x1x128xf32> -> vector<2x16x128xf32>
    %225 = vector.shape_cast %21 : vector<1x16x128xi1> to vector<1x16x128xi1>
    %226 = vector.broadcast %225 : vector<1x16x128xi1> to vector<2x16x128xi1>
    %227 = arith.select %226, %182, %222 : vector<2x16x128xi1>, vector<2x16x128xf32>
    %228 = vector.shape_cast %23 : vector<1x16x128xi1> to vector<1x16x128xi1>
    %229 = vector.broadcast %228 : vector<1x16x128xi1> to vector<2x16x128xi1>
    %230 = arith.select %229, %182, %224 : vector<2x16x128xi1>, vector<2x16x128xf32>
    %231 = arith.minimumf %227, %182 : vector<2x16x128xf32>
    %232 = arith.minimumf %231, %230 : vector<2x16x128xf32>
    %233 = vector.extract_strided_slice %182 {offsets = [0, 0, 0], sizes = [2, 16, 1], strides = [1, 1, 1]} : vector<2x16x128xf32> to vector<2x16x1xf32>
    %234 = vector.extract_strided_slice %182 {offsets = [0, 0, 127], sizes = [2, 16, 1], strides = [1, 1, 1]} : vector<2x16x128xf32> to vector<2x16x1xf32>
    %235 = vector.extract_strided_slice %182 {offsets = [0, 0, 0], sizes = [2, 16, 127], strides = [1, 1, 1]} : vector<2x16x128xf32> to vector<2x16x127xf32>
    %236 = tpu.concatenate %233, %235 in 2 : vector<2x16x1xf32>, vector<2x16x127xf32> -> vector<2x16x128xf32>
    %237 = vector.extract_strided_slice %182 {offsets = [0, 0, 1], sizes = [2, 16, 127], strides = [1, 1, 1]} : vector<2x16x128xf32> to vector<2x16x127xf32>
    %238 = tpu.concatenate %237, %234 in 2 : vector<2x16x127xf32>, vector<2x16x1xf32> -> vector<2x16x128xf32>
    %239 = vector.shape_cast %25 : vector<1x16x128xi1> to vector<1x16x128xi1>
    %240 = vector.broadcast %239 : vector<1x16x128xi1> to vector<2x16x128xi1>
    %241 = arith.select %240, %182, %236 : vector<2x16x128xi1>, vector<2x16x128xf32>
    %242 = vector.shape_cast %27 : vector<1x16x128xi1> to vector<1x16x128xi1>
    %243 = vector.broadcast %242 : vector<1x16x128xi1> to vector<2x16x128xi1>
    %244 = arith.select %243, %182, %238 : vector<2x16x128xi1>, vector<2x16x128xf32>
    %245 = arith.minimumf %241, %182 : vector<2x16x128xf32>
    %246 = arith.minimumf %245, %244 : vector<2x16x128xf32>
    %247 = arith.minimumf %232, %246 : vector<2x16x128xf32>
    %248 = vector.extract_strided_slice %247 {offsets = [0, 0, 0], sizes = [2, 1, 128], strides = [1, 1, 1]} : vector<2x16x128xf32> to vector<2x1x128xf32>
    %249 = vector.extract_strided_slice %247 {offsets = [0, 15, 0], sizes = [2, 1, 128], strides = [1, 1, 1]} : vector<2x16x128xf32> to vector<2x1x128xf32>
    %250 = vector.extract_strided_slice %247 {offsets = [0, 0, 0], sizes = [2, 15, 128], strides = [1, 1, 1]} : vector<2x16x128xf32> to vector<2x15x128xf32>
    %251 = tpu.concatenate %248, %250 in 1 : vector<2x1x128xf32>, vector<2x15x128xf32> -> vector<2x16x128xf32>
    %252 = vector.extract_strided_slice %247 {offsets = [0, 1, 0], sizes = [2, 15, 128], strides = [1, 1, 1]} : vector<2x16x128xf32> to vector<2x15x128xf32>
    %253 = tpu.concatenate %252, %249 in 1 : vector<2x15x128xf32>, vector<2x1x128xf32> -> vector<2x16x128xf32>
    %254 = vector.shape_cast %21 : vector<1x16x128xi1> to vector<1x16x128xi1>
    %255 = vector.broadcast %254 : vector<1x16x128xi1> to vector<2x16x128xi1>
    %256 = arith.select %255, %247, %251 : vector<2x16x128xi1>, vector<2x16x128xf32>
    %257 = vector.shape_cast %23 : vector<1x16x128xi1> to vector<1x16x128xi1>
    %258 = vector.broadcast %257 : vector<1x16x128xi1> to vector<2x16x128xi1>
    %259 = arith.select %258, %247, %253 : vector<2x16x128xi1>, vector<2x16x128xf32>
    %260 = arith.maximumf %256, %247 : vector<2x16x128xf32>
    %261 = arith.maximumf %260, %259 : vector<2x16x128xf32>
    %262 = vector.extract_strided_slice %261 {offsets = [0, 0, 0], sizes = [2, 16, 1], strides = [1, 1, 1]} : vector<2x16x128xf32> to vector<2x16x1xf32>
    %263 = vector.extract_strided_slice %261 {offsets = [0, 0, 127], sizes = [2, 16, 1], strides = [1, 1, 1]} : vector<2x16x128xf32> to vector<2x16x1xf32>
    %264 = vector.extract_strided_slice %261 {offsets = [0, 0, 0], sizes = [2, 16, 127], strides = [1, 1, 1]} : vector<2x16x128xf32> to vector<2x16x127xf32>
    %265 = tpu.concatenate %262, %264 in 2 : vector<2x16x1xf32>, vector<2x16x127xf32> -> vector<2x16x128xf32>
    %266 = vector.extract_strided_slice %261 {offsets = [0, 0, 1], sizes = [2, 16, 127], strides = [1, 1, 1]} : vector<2x16x128xf32> to vector<2x16x127xf32>
    %267 = tpu.concatenate %266, %263 in 2 : vector<2x16x127xf32>, vector<2x16x1xf32> -> vector<2x16x128xf32>
    %268 = vector.shape_cast %25 : vector<1x16x128xi1> to vector<1x16x128xi1>
    %269 = vector.broadcast %268 : vector<1x16x128xi1> to vector<2x16x128xi1>
    %270 = arith.select %269, %261, %265 : vector<2x16x128xi1>, vector<2x16x128xf32>
    %271 = vector.shape_cast %27 : vector<1x16x128xi1> to vector<1x16x128xi1>
    %272 = vector.broadcast %271 : vector<1x16x128xi1> to vector<2x16x128xi1>
    %273 = arith.select %272, %261, %267 : vector<2x16x128xi1>, vector<2x16x128xf32>
    %274 = arith.maximumf %270, %261 : vector<2x16x128xf32>
    %275 = arith.maximumf %274, %273 : vector<2x16x128xf32>
    %276 = arith.subf %182, %275 : vector<2x16x128xf32>
    %cst_15 = arith.constant 0.000000e+00 : f32
    %277 = vector.broadcast %cst_15 : f32 to vector<2x16x128xf32>
    %278 = arith.maximumf %276, %277 : vector<2x16x128xf32>
    %279 = arith.mulf %218, %278 : vector<2x16x128xf32>
    %280 = arith.subf %278, %279 : vector<2x16x128xf32>
    %cst_16 = arith.constant 0.000000e+00 : f32
    %281 = vector.broadcast %cst_16 : f32 to vector<2x16x128xf32>
    %282 = arith.maximumf %280, %281 : vector<2x16x128xf32>
    %283 = arith.addf %218, %282 : vector<2x16x128xf32>
    %284 = vector.extract_strided_slice %283 {offsets = [0, 0, 0], sizes = [1, 16, 128], strides = [1, 1, 1]} : vector<2x16x128xf32> to vector<1x16x128xf32>
    %285 = vector.extract_strided_slice %283 {offsets = [1, 0, 0], sizes = [1, 16, 128], strides = [1, 1, 1]} : vector<2x16x128xf32> to vector<1x16x128xf32>
    %286 = arith.mulf %1, %0 : vector<1x16x128xf32>
    %cst_17 = arith.constant dense<0.000000e+00> : vector<128xf32>
    %287 = vector.multi_reduction <add>, %286, %cst_17 [0, 1] : vector<1x16x128xf32> to vector<128xf32>
    %288 = vector.shape_cast %287 : vector<128xf32> to vector<1x1x128xf32>
    %289 = vector.shape_cast %288 : vector<1x1x128xf32> to vector<1x128xf32>
    %cst_18 = arith.constant dense<0.000000e+00> : vector<128xf32>
    %290 = vector.multi_reduction <add>, %0, %cst_18 [0, 1] : vector<1x16x128xf32> to vector<128xf32>
    %291 = vector.shape_cast %290 : vector<128xf32> to vector<1x1x128xf32>
    %292 = vector.shape_cast %291 : vector<1x1x128xf32> to vector<1x128xf32>
    %cst_19 = arith.constant dense<0.000000e+00> : vector<128xf32>
    %293 = vector.multi_reduction <add>, %1, %cst_19 [0, 1] : vector<1x16x128xf32> to vector<128xf32>
    %294 = vector.shape_cast %293 : vector<128xf32> to vector<1x1x128xf32>
    %295 = vector.shape_cast %294 : vector<1x1x128xf32> to vector<1x128xf32>
    %296 = arith.mulf %284, %1 : vector<1x16x128xf32>
    %cst_20 = arith.constant dense<0.000000e+00> : vector<128xf32>
    %297 = vector.multi_reduction <add>, %296, %cst_20 [0, 1] : vector<1x16x128xf32> to vector<128xf32>
    %298 = vector.shape_cast %297 : vector<128xf32> to vector<1x1x128xf32>
    %299 = vector.shape_cast %298 : vector<1x1x128xf32> to vector<1x128xf32>
    %cst_21 = arith.constant dense<0.000000e+00> : vector<128xf32>
    %300 = vector.multi_reduction <add>, %284, %cst_21 [0, 1] : vector<1x16x128xf32> to vector<128xf32>
    %301 = vector.shape_cast %300 : vector<128xf32> to vector<1x1x128xf32>
    %302 = vector.shape_cast %301 : vector<1x1x128xf32> to vector<1x128xf32>
    %303 = arith.mulf %285, %0 : vector<1x16x128xf32>
    %cst_22 = arith.constant dense<0.000000e+00> : vector<128xf32>
    %304 = vector.multi_reduction <add>, %303, %cst_22 [0, 1] : vector<1x16x128xf32> to vector<128xf32>
    %305 = vector.shape_cast %304 : vector<128xf32> to vector<1x1x128xf32>
    %306 = vector.shape_cast %305 : vector<1x1x128xf32> to vector<1x128xf32>
    %cst_23 = arith.constant dense<0.000000e+00> : vector<128xf32>
    %307 = vector.multi_reduction <add>, %285, %cst_23 [0, 1] : vector<1x16x128xf32> to vector<128xf32>
    %308 = vector.shape_cast %307 : vector<128xf32> to vector<1x1x128xf32>
    %309 = vector.shape_cast %308 : vector<1x1x128xf32> to vector<1x128xf32>
    %cst_24 = arith.constant 0.000000e+00 : f32
    %310 = vector.broadcast %cst_24 : f32 to vector<1x128xf32>
    %311 = tpu.concatenate %289, %292, %295, %299, %302, %306, %309, %310 in 0 : vector<1x128xf32>, vector<1x128xf32>, vector<1x128xf32>, vector<1x128xf32>, vector<1x128xf32>, vector<1x128xf32>, vector<1x128xf32>, vector<1x128xf32> -> vector<8x128xf32>
    %312 = vector.shape_cast %311 : vector<8x128xf32> to vector<1x8x128xf32>
    %c0_25 = arith.constant 0 : index
    %c0_26 = arith.constant 0 : index
    %c0_27 = arith.constant 0 : index
    %313 = vector.load %arg3[%c0_25, %c0_26, %c0_27] : memref<1x8x128xf32, #tpu.memory_space<vmem>>, vector<1x8x128xf32>
    tpu.vector_store %arg3[%c0_25, %c0_26, %c0_27], %312 {strides = array<i32>} : memref<1x8x128xf32, #tpu.memory_space<vmem>>, vector<1x8x128xf32>,
    return
  }
  func.func @transform_0(%arg0: i32) -> (i32, i32, i32) {
    %c0_i32 = arith.constant 0 : i32
    %c0_i32_0 = arith.constant 0 : i32
    %c0_i32_1 = arith.constant 0 : i32
    return %arg0, %c0_i32, %c0_i32_0 : i32, i32, i32
  }
  func.func @transform_1(%arg0: i32) -> (i32, i32, i32) {
    %c0_i32 = arith.constant 0 : i32
    %c0_i32_0 = arith.constant 0 : i32
    %c0_i32_1 = arith.constant 0 : i32
    return %arg0, %c0_i32, %c0_i32_0 : i32, i32, i32
  }
  func.func @transform_2(%arg0: i32) -> (i32, i32, i32) {
    %c0_i32 = arith.constant 0 : i32
    %c0_i32_0 = arith.constant 0 : i32
    %c0_i32_1 = arith.constant 0 : i32
    return %arg0, %c0_i32, %c0_i32_0 : i32, i32, i32
  }
}

</mosaic_0001>

<bundles_post_ra>
// kernel: tpu_custom_call.1
= control target key start
LH: loop header
LB: loop body
LE: loop exit
PB: predicated region body
PF: predicated region fallthrough
CT: control target
= control target key end

     0   :  { %6 = vsyncpa [#allocation3], 0  ;;  %s152_s0 = inlined_call_operand.hbm [shape: f32[2,8,128], index: 0, kind: input, shape index: {}]   ;;  %s153_s1 = inlined_call_operand.hbm [shape: f32[2,8,128], index: 1, kind: output, shape index: {}]  }
   0x1   :  { %7 = vsyncpa [#allocation4], 0  ;;  %s107_s6 = smov [#allocation2]   ;;  %s59_s10 = scalar_lea.hbm %s152_s0, 256 }
   0x2   :  { %s13_s7 = sshll.u32 %s107_s6, 4  ;;  %p60_p0 = scmp.ne.s32.totalorder %s152_s0, %s59_s10  ;;  %s14_s7 = int_to_ptr.vmem [resolvable:$true] %s13_s7 }
   0x3   :  { %p63_p1 = scmp.lt.u32.totalorder %s59_s10, %s152_s0 }
   0x5   :  { %p65_p2 = pnand %p63_p1, %p60_p0 }
   0x7   :  { %68 = shalt.err (!%p65_p2)
}
   0x8   :  { %s69_s15 = scalar_lea.vmem %s14_s7, 256  ;;  %p74_p4 = scmp.lt.s32.totalorder %s14_s7, %s14_s7 }
   0x9   :  { %p70_p3 = scmp.ne.s32.totalorder %s14_s7, %s69_s15  ;;  %p75_p5 = scmp.lt.s32.totalorder %s69_s15, %s69_s15 }
   0xb   :  { %p76_p6 = por %p75_p5, %p74_p4 }
   0xd   :  { %p77_p7 = pnand %p76_p6, %p70_p3 }
   0xf   :  { %80 = shalt.err (!%p77_p7)
}
  0x10   :  { %s108_s16 = smov 128   ;;  %s109_s17 = smov 8  }
  0x11   :  { %19 = dma.hbm_to_vmem [thread:$0]  %s152_s0, 256, %s14_s7, [#allocation3], %s108_s16, %s108_s16, %s109_s17  }
  0x12   :  { %103 = dma.done.wait [#allocation3], 256  }
  0x13   :  { %104 = vsyncadd [#allocation3], 4294967040  ;;  %v23_v0 = vld [vmem:[#allocation2] sm:$0xff]  ;;  %s110_s20 = smov 1   ;;  %v24_v1 = vld [vmem:[#allocation2 + $0x8] sm:$0xff]  ;;  %s111_s21 = smov [#allocation5]  }
  0x14   :  { %27 = vrot.lane.b32.xlu0 %v23_v0, %s110_s20  ;;  %v25_v2 = vrot.slane %v23_v0, 7  ;;  %v26_v5 = vrot.slane %v24_v1, 7  ;;  %s42_s22 = sshll.u32 %s111_s21, 4  ;;  %s43_s22 = int_to_ptr.vmem [resolvable:$true] %s42_s22 }
  0x15   :  { %s81_s0 = scalar_lea.vmem %s43_s22, 256  ;;  %p86_p9 = scmp.lt.s32.totalorder %s43_s22, %s43_s22 }
  0x16   :  { %p82_p8 = scmp.ne.s32.totalorder %s43_s22, %s81_s0  ;;  %p87_p10 = scmp.lt.s32.totalorder %s81_s0, %s81_s0 }
  0x18   :  { %29 = vrot.lane.b32.xlu0 %v24_v1, %s110_s20  ;;  %p88_p11 = por %p87_p10, %p86_p9 }
  0x1a   :  { %p89_p12 = pnand %p88_p11, %p82_p8 }
  0x86   :  { %v28_v3 = vpop.permute.xlu0 %27 }
  0x87   :  { %v31_v4 = vmul.f32 2.0, %v28_v3 }
  0x89   :  { %v33_v6 = vadd.f32 %v31_v4, %v25_v2 }
  0x8a   :  { %v30_v7 = vpop.permute.xlu0 %29 }
  0x8b   :  { %35 = vst [vmem:[#allocation5] sm:$0xff] %v33_v6  ;;  %v32_v8 = vmul.f32 2.0, %v30_v7 }
  0x8d   :  { %v34_v9 = vadd.f32 %v32_v8, %v26_v5 }
  0x8f   :  { %36 = vst [vmem:[#allocation5 + $0x8] sm:$0xff] %v34_v9 }
  0x90   :  { %92 = shalt.err (!%p89_p12)
}
  0x91   :  { %s93_s25 = scalar_lea.hbm %s153_s1, 256 }
  0x92   :  { %p94_p13 = scmp.ne.s32.totalorder %s153_s1, %s93_s25  ;;  %p97_p0 = scmp.lt.u32.totalorder %s93_s25, %s153_s1 }
  0x94   :  { %p99_p1 = pnand %p97_p0, %p94_p13 }
  0x96   :  { %102 = shalt.err (!%p99_p1)
}
  0x97   :  { %48 = dma.vmem_to_hbm [thread:$0]  %s43_s22, 256, %s153_s1, [#allocation4], %s108_s16, %s108_s16, %s109_s17  }
  0x98   :  { %105 = dma.done.wait [#allocation4], 256  }
  0x99   :  { %106 = vsyncadd [#allocation4], 4294967040 }
  0x9a   :  { %52 = vsyncpa [#allocation3], 1 }
  0x9b   :  { %53 = vsyncpa [#allocation4], 1 }

// kernel: tpu_custom_call.1
= control target key start
LH: loop header
LB: loop body
LE: loop exit
PB: predicated region body
PF: predicated region fallthrough
CT: control target
= control target key end

     0   :  { %7 = vsyncpa [#allocation3], 0  ;;  %s1865_s0 = inlined_call_operand.hbm [shape: f32[1,16,128], index: 0, kind: input, shape index: {}]   ;;  %s1866_s1 = inlined_call_operand.hbm [shape: f32[1,16,128], index: 1, kind: input, shape index: {}]   ;;  %s1867_s2 = inlined_call_operand.hbm [shape: f32[1,8,128], index: 2, kind: output, shape index: {}]  }
   0x1   :  { %8 = vsyncpa [#allocation6], 0 }
   0x2   :  { %9 = vsyncpa [#allocation4], 0  ;;  %s990_s9 = smov [#allocation2]   ;;  %s918_s13 = scalar_lea.hbm %s1865_s0, 256 }
   0x3   :  { %s15_s10 = sshll.u32 %s990_s9, 4  ;;  %p919_p0 = scmp.ne.s32.totalorder %s1865_s0, %s918_s13  ;;  %s16_s10 = int_to_ptr.vmem [resolvable:$true] %s15_s10 }
   0x4   :  { %p922_p1 = scmp.lt.u32.totalorder %s918_s13, %s1865_s0 }
   0x6   :  { %p924_p2 = pnand %p922_p1, %p919_p0 }
   0x8   :  { %927 = shalt.err (!%p924_p2)
}
   0x9   :  { %s928_s18 = scalar_lea.vmem %s16_s10, 256  ;;  %p933_p4 = scmp.lt.s32.totalorder %s16_s10, %s16_s10 }
   0xa   :  { %p929_p3 = scmp.ne.s32.totalorder %s16_s10, %s928_s18  ;;  %p934_p5 = scmp.lt.s32.totalorder %s928_s18, %s928_s18 }
   0xc   :  { %p935_p6 = por %p934_p5, %p933_p4 }
   0xe   :  { %p936_p7 = pnand %p935_p6, %p929_p3 }
  0x10   :  { %939 = shalt.err (!%p936_p7)
}
  0x11   :  { %s991_s19 = smov 128   ;;  %s992_s20 = smov 8  }
  0x12   :  { %21 = dma.hbm_to_vmem [thread:$0]  %s1865_s0, 256, %s16_s10, [#allocation3], %s991_s19, %s991_s19, %s992_s20  }
  0x13   :  { %s993_s23 = smov [#allocation5]   ;;  %s940_s27 = scalar_lea.hbm %s1866_s1, 256 }
  0x14   :  { %s27_s24 = sshll.u32 %s993_s23, 4  ;;  %p941_p8 = scmp.ne.s32.totalorder %s1866_s1, %s940_s27  ;;  %s28_s24 = int_to_ptr.vmem [resolvable:$true] %s27_s24 }
  0x15   :  { %p944_p9 = scmp.lt.u32.totalorder %s940_s27, %s1866_s1 }
  0x17   :  { %p946_p10 = pnand %p944_p9, %p941_p8 }
  0x19   :  { %949 = shalt.err (!%p946_p10)
}
  0x1a   :  { %s950_s4 = scalar_lea.vmem %s28_s24, 256  ;;  %p955_p12 = scmp.lt.s32.totalorder %s28_s24, %s28_s24 }
  0x1b   :  { %p951_p11 = scmp.ne.s32.totalorder %s28_s24, %s950_s4  ;;  %p956_p13 = scmp.lt.s32.totalorder %s950_s4, %s950_s4 }
  0x1d   :  { %p957_p0 = por %p956_p13, %p955_p12 }
  0x1f   :  { %p958_p1 = pnand %p957_p0, %p951_p11 }
  0x21   :  { %961 = shalt.err (!%p958_p1)
}
  0x22   :  { %33 = dma.hbm_to_vmem [thread:$0]  %s1866_s1, 256, %s28_s24, [#allocation6], %s991_s19, %s991_s19, %s992_s20  }
  0x23   :  { %984 = dma.done.wait [#allocation3], 256  }
  0x24   :  { %985 = vsyncadd [#allocation3], 4294967040 }
  0x25   :  { %986 = dma.done.wait [#allocation6], 256  }
  0x26   :  { %987 = vsyncadd [#allocation6], 4294967040  ;;  %v1036_v0 = vld [vmem:[#allocation2] sm:$0xff]  ;;  %v1038_v1 = vld [vmem:[#allocation5] sm:$0xff]  ;;  %s994_s6 = smov 1   ;;  %s995_s7 = smov 127   ;;  %v44_v4 = vlaneseq }
  0x27   :  { %125 = vrot.lane.b32.xlu1 %v1038_v1, %s994_s6  ;;  %121 = vrot.lane.b32.xlu0 %v1036_v0, %s994_s6  ;;  %v1044_v2 = vld [vmem:[#allocation2 + $0x8] sm:$0xff]  ;;  %v1050_v3 = vld [vmem:[#allocation5 + $0x8] sm:$0xff]  ;;  %v72_v6 = vrot.slane %v1036_v0, 7  ;;  %vm71_vm0 = vcmask 1040384   ;;  %v85_v13 = vrot.slane %v1036_v0, 1  ;;  %v75_v15 = vrot.slane %v1038_v1, 7 }
  0x28   :  { %v1060_v5 = vshrl.u32 %v44_v4, 7  ;;  %v48_v7 = vand.u32 127, %v44_v4  ;;  %v73_v11 = vrot.slane %v1044_v2, 7  ;;  %v86_v12 = vrot.slane %v1044_v2, 1  ;;  %s996_s1 = smov [#allocation7]  }
  0x29   :  { %v82_v8 = vsel %vm71_vm0, %v1036_v0, %v72_v6  ;;  %vm133_vm2 = vcmask 7168   ;;  %vm84_vm3 = vcmask 1046528   ;;  %v76_v17 = vrot.slane %v1050_v3, 7  ;;  %s897_s8 = sshll.u32 %s996_s1, 4  ;;  %s898_s8 = int_to_ptr.vmem [resolvable:$true] %s897_s8 }
  0x2a   :  { %vm61_vm1 = vcmp.eq.s32.totalorder %v1060_v5, 0  ;;  %v53_v9 = vand.u32 15, %v48_v7  ;;  %v1067_v10 = vadd.s32 8, %v1060_v5  ;;  %v95_v21 = vsel %vm84_vm3, %v86_v12, %v1044_v2  ;;  %s962_s9 = scalar_lea.vmem %s898_s8, 128  ;;  %p967_p3 = scmp.lt.s32.totalorder %s898_s8, %s898_s8 }
  0x2b   :  { %138 = vrot.lane.b32.xlu1 %v1036_v0, %s995_s7  ;;  %123 = vrot.lane.b32.xlu0 %v1044_v2, %s994_s6  ;;  %v101_v14 = vsel %vm61_vm1, %v1036_v0, %v82_v8  ;;  %v74_v22 = vsel %vm71_vm0, %v72_v6, %v73_v11  ;;  %v89_v23 = vrot.slane %v1050_v3, 1  ;;  %v87_v25 = vsel %vm84_vm3, %v85_v13, %v86_v12  ;;  %p963_p2 = scmp.ne.s32.totalorder %s898_s8, %s962_s9  ;;  %p968_p4 = scmp.lt.s32.totalorder %s962_s9, %s962_s9 }
  0x2c   :  { %vm1076_vm4 = vcmp.eq.s32.totalorder %v53_v9, 0  ;;  %vm64_vm5 = vcmp.eq.s32.totalorder %v1067_v10, 15  ;;  %v113_v20 = vmin.f32 %v101_v14, %v1036_v0  ;;  %v83_v26 = vsel %vm71_vm0, %v1038_v1, %v75_v15 }
  0x2d   :  { %vm150_vm6 = vcmask 1039360   ;;  %vm1095_vm7 = vcmp.eq.s32.totalorder %v53_v9, 15  ;;  %v110_v29 = vsel %vm64_vm5, %v1044_v2, %v95_v21  ;;  %v114_v30 = vmin.f32 %v74_v22, %v1044_v2  ;;  %p969_p5 = por %p968_p4, %p967_p3 }
  0x2e   :  { %v88_v31 = vrot.slane %v1038_v1, 1  ;;  %v117_v33 = vmin.f32 %v113_v20, %v87_v25  ;;  %v77_v35 = vsel %vm71_vm0, %v75_v15, %v76_v17  ;;  %v96_v36 = vsel %vm84_vm3, %v89_v23, %v1050_v3 }
  0x2f   :  { %140 = vrot.lane.b32.xlu1 %v1044_v2, %s995_s7  ;;  %127 = vrot.lane.b32.xlu0 %v1050_v3, %s994_s6  ;;  %v103_v37 = vsel %vm61_vm1, %v1038_v1, %v83_v26  ;;  %v118_v45 = vmin.f32 %v114_v30, %v110_v29  ;;  %v116_v46 = vmin.f32 %v77_v35, %v1050_v3  ;;  %vm879_vm8 = vcmask 1041408   ;;  %p970_p6 = pnand %p969_p5, %p963_p2 }
  0x30   :  { %v112_v50 = vsel %vm64_vm5, %v1050_v3, %v96_v36  ;;  %v90_v51 = vsel %vm84_vm3, %v88_v31, %v89_v23  ;;  %v115_v52 = vmin.f32 %v103_v37, %v1038_v1  ;;  %vm881_vm9 = vcmask 1042432  }
  0x31   :  { %v120_v63 = vmin.f32 %v116_v46, %v112_v50  ;;  %vm883_vm10 = vcmask 1043456   ;;  %vm885_vm11 = vcmask 1044480   ;;  %vm887_vm12 = vcmask 1045504  }
  0x32   :  { %v119_v6 = vmin.f32 %v115_v52, %v90_v51 }
  0x33   :  { %144 = vrot.lane.b32.xlu1 %v1050_v3, %s995_s7  ;;  %142 = vrot.lane.b32.xlu0 %v1038_v1, %s995_s7 }
  0x99   :  { %v126_v18 = vpop.permute.xlu1 %125  ;;  %v122_v19 = vpop.permute.xlu0 %121 }
  0x9a   :  { %v134_v24 = vsel %vm133_vm2, %v1036_v0, %v122_v19  ;;  %v136_v38 = vsel %vm133_vm2, %v1038_v1, %v126_v18 }
  0x9b   :  { %v157_v27 = vsel %vm1076_vm4, %v1036_v0, %v134_v24  ;;  %v159_v47 = vsel %vm1076_vm4, %v1038_v1, %v136_v38 }
  0x9c   :  { %v167_v39 = vmin.f32 %v157_v27, %v1036_v0  ;;  %v169_v61 = vmin.f32 %v159_v47, %v1038_v1 }
  0x9d   :  { %v139_v32 = vpop.permute.xlu1 %138  ;;  %v124_v34 = vpop.permute.xlu0 %123 }
  0x9e   :  { %v151_v40 = vsel %vm150_vm6, %v139_v32, %v1036_v0  ;;  %v135_v41 = vsel %vm133_vm2, %v1044_v2, %v124_v34 }
  0x9f   :  { %v163_v42 = vsel %vm1095_vm7, %v1036_v0, %v151_v40  ;;  %v158_v43 = vsel %vm1076_vm4, %v1044_v2, %v135_v41 }
  0xa0   :  { %v171_v44 = vmin.f32 %v167_v39, %v163_v42  ;;  %v168_v54 = vmin.f32 %v158_v43, %v1044_v2 }
  0xa1   :  { %v141_v48 = vpop.permute.xlu1 %140  ;;  %v128_v49 = vpop.permute.xlu0 %127 }
  0xa2   :  { %v1132_v53 = vmin.f32 %v117_v33, %v171_v44  ;;  %v152_v55 = vsel %vm150_vm6, %v141_v48, %v1044_v2  ;;  %v137_v56 = vsel %vm133_vm2, %v1050_v3, %v128_v49 }
  0xa3   :  { %v164_v57 = vsel %vm1095_vm7, %v1044_v2, %v152_v55  ;;  %v160_v58 = vsel %vm1076_vm4, %v1050_v3, %v137_v56 }
  0xa4   :  { %v172_v59 = vmin.f32 %v168_v54, %v164_v57  ;;  %291 = vrot.lane.b32.xlu0 %v1132_v53, %s994_s6  ;;  %v183_v60 = vrot.slane %v1132_v53, 7  ;;  %v170_v62 = vmin.f32 %v160_v58, %v1050_v3  ;;  %v195_v20 = vrot.slane %v1132_v53, 1 }
  0xa5   :  { %v145_v4 = vpop.permute.xlu1 %144  ;;  %v143_v7 = vpop.permute.xlu0 %142 }
  0xa6   :  { %v1150_v8 = vmin.f32 %v118_v45, %v172_v59  ;;  %v154_v9 = vsel %vm150_vm6, %v145_v4, %v1050_v3  ;;  %v153_v11 = vsel %vm150_vm6, %v143_v7, %v1038_v1  ;;  %v193_v12 = vsel %vm71_vm0, %v1132_v53, %v183_v60 }
  0xa7   :  { %v166_v13 = vsel %vm1095_vm7, %v1050_v3, %v154_v9  ;;  %v165_v14 = vsel %vm1095_vm7, %v1038_v1, %v153_v11  ;;  %v207_v15 = vsel %vm61_vm1, %v1132_v53, %v193_v12 }
  0xa8   :  { %v174_v17 = vmin.f32 %v170_v62, %v166_v13  ;;  %v173_v18 = vmin.f32 %v169_v61, %v165_v14  ;;  %293 = vrot.lane.b32.xlu1 %v1150_v8, %s994_s6  ;;  %v215_v19 = vmax.f32 %v207_v15, %v1132_v53  ;;  %v196_v21 = vrot.slane %v1150_v8, 1 }
  0xa9   :  { %v184_v22 = vrot.slane %v1150_v8, 7  ;;  %v283_v52 = vmin.f32 %v207_v15, %v1132_v53 }
  0xaa   :  { %v1173_v23 = vmin.f32 %v120_v63, %v174_v17  ;;  %v1175_v24 = vmin.f32 %v119_v6, %v173_v18  ;;  %v197_v25 = vsel %vm84_vm3, %v195_v20, %v196_v21  ;;  %v205_v27 = vsel %vm84_vm3, %v196_v21, %v1150_v8 }
  0xab   :  { %v185_v26 = vsel %vm71_vm0, %v183_v60, %v184_v22  ;;  %v1185_v29 = vmax.f32 %v215_v19, %v197_v25  ;;  %v212_v30 = vsel %vm64_vm5, %v1150_v8, %v205_v27  ;;  %v287_v61 = vmin.f32 %v283_v52, %v197_v25 }
  0xac   :  { %295 = vrot.lane.b32.xlu0 %v1175_v24, %s994_s6  ;;  %307 = vrot.lane.b32.xlu1 %v1132_v53, %s995_s7  ;;  %v186_v31 = vrot.slane %v1175_v24, 7  ;;  %v216_v32 = vmax.f32 %v185_v26, %v1150_v8  ;;  %v198_v33 = vrot.slane %v1175_v24, 1  ;;  %v199_v34 = vrot.slane %v1173_v23, 1 }
  0xad   :  { %v187_v36 = vrot.slane %v1173_v23, 7  ;;  %v284_v63 = vmin.f32 %v185_v26, %v1150_v8 }
  0xae   :  { %v194_v35 = vsel %vm71_vm0, %v1175_v24, %v186_v31  ;;  %v1197_v37 = vmax.f32 %v216_v32, %v212_v30  ;;  %v200_v41 = vsel %vm84_vm3, %v198_v33, %v199_v34  ;;  %v206_v42 = vsel %vm84_vm3, %v199_v34, %v1173_v23 }
  0xaf   :  { %v209_v38 = vsel %vm61_vm1, %v1175_v24, %v194_v35  ;;  %v188_v40 = vsel %vm71_vm0, %v186_v31, %v187_v36  ;;  %v214_v45 = vsel %vm64_vm5, %v1173_v23, %v206_v42  ;;  %v288_v15 = vmin.f32 %v284_v63, %v212_v30 }
  0xb0   :  { %297 = vrot.lane.b32.xlu0 %v1173_v23, %s994_s6  ;;  %309 = vrot.lane.b32.xlu1 %v1150_v8, %s995_s7  ;;  %v217_v39 = vmax.f32 %v209_v38, %v1175_v24  ;;  %v218_v43 = vmax.f32 %v188_v40, %v1173_v23  ;;  %v285_v18 = vmin.f32 %v209_v38, %v1175_v24 }
  0xb1   :  { %v286_v35 = vmin.f32 %v188_v40, %v1173_v23 }
  0xb2   :  { %v1212_v44 = vmax.f32 %v217_v39, %v200_v41  ;;  %v1217_v46 = vmax.f32 %v218_v43, %v214_v45  ;;  %v289_v33 = vmin.f32 %v285_v18, %v200_v41 }
  0xb3   :  { %v290_v39 = vmin.f32 %v286_v35, %v214_v45 }
  0xb4   :  { %311 = vrot.lane.b32.xlu0 %v1175_v24, %s995_s7  ;;  %313 = vrot.lane.b32.xlu1 %v1173_v23, %s995_s7 }
 0x116   :  { %v292_v47 = vpop.permute.xlu0 %291 }
 0x117   :  { %v303_v48 = vsel %vm133_vm2, %v1132_v53, %v292_v47 }
 0x118   :  { %v323_v50 = vsel %vm1076_vm4, %v1132_v53, %v303_v48 }
 0x119   :  { %v331_v56 = vmin.f32 %v323_v50, %v1132_v53 }
 0x11a   :  { %v294_v49 = vpop.permute.xlu1 %293 }
 0x11b   :  { %v304_v51 = vsel %vm133_vm2, %v1150_v8, %v294_v49 }
 0x11c   :  { %v324_v58 = vsel %vm1076_vm4, %v1150_v8, %v304_v51 }
 0x11d   :  { %v332_v7 = vmin.f32 %v324_v58, %v1150_v8 }
 0x11e   :  { %v296_v54 = vpop.permute.xlu0 %295  ;;  %v308_v55 = vpop.permute.xlu1 %307 }
 0x11f   :  { %v319_v57 = vsel %vm150_vm6, %v308_v55, %v1132_v53  ;;  %v305_v60 = vsel %vm133_vm2, %v1175_v24, %v296_v54 }
 0x120   :  { %v327_v59 = vsel %vm1095_vm7, %v1132_v53, %v319_v57  ;;  %v325_v13 = vsel %vm1076_vm4, %v1175_v24, %v305_v60 }
 0x121   :  { %v335_v62 = vmin.f32 %v331_v56, %v327_v59  ;;  %v333_v22 = vmin.f32 %v325_v13, %v1175_v24 }
 0x122   :  { %v298_v4 = vpop.permute.xlu0 %297  ;;  %v310_v6 = vpop.permute.xlu1 %309 }
 0x123   :  { %v1244_v9 = vmin.f32 %v287_v61, %v335_v62  ;;  %v306_v11 = vsel %vm133_vm2, %v1173_v23, %v298_v4  ;;  %v320_v12 = vsel %vm150_vm6, %v310_v6, %v1150_v8 }
 0x124   :  { %v328_v14 = vsel %vm1095_vm7, %v1150_v8, %v320_v12  ;;  %v326_v19 = vsel %vm1076_vm4, %v1173_v23, %v306_v11 }
 0x125   :  { %v336_v17 = vmin.f32 %v332_v7, %v328_v14  ;;  %471 = vrot.lane.b32.xlu0 %v1244_v9, %s994_s6  ;;  %v334_v32 = vmin.f32 %v326_v19, %v1173_v23  ;;  %v347_v40 = vrot.slane %v1244_v9, 7  ;;  %v359_v52 = vrot.slane %v1244_v9, 1 }
 0x126   :  { %v312_v20 = vpop.permute.xlu0 %311  ;;  %v314_v21 = vpop.permute.xlu1 %313 }
 0x127   :  { %v1263_v25 = vmin.f32 %v288_v15, %v336_v17  ;;  %v321_v26 = vsel %vm150_vm6, %v312_v20, %v1175_v24  ;;  %v322_v27 = vsel %vm150_vm6, %v314_v21, %v1173_v23  ;;  %v357_v43 = vsel %vm71_vm0, %v1244_v9, %v347_v40 }
 0x128   :  { %v329_v30 = vsel %vm1095_vm7, %v1175_v24, %v321_v26  ;;  %v330_v31 = vsel %vm1095_vm7, %v1173_v23, %v322_v27  ;;  %v1304_v48 = vsel %vm61_vm1, %v1244_v9, %v357_v43 }
 0x129   :  { %v337_v34 = vmin.f32 %v333_v22, %v329_v30  ;;  %473 = vrot.lane.b32.xlu1 %v1263_v25, %s994_s6  ;;  %v338_v38 = vmin.f32 %v334_v32, %v330_v31  ;;  %v360_v49 = vrot.slane %v1263_v25, 1  ;;  %v348_v50 = vrot.slane %v1263_v25, 7 }
 0x12a   :  { %v463_v56 = vmin.f32 %v1304_v48, %v1244_v9 }
 0x12b   :  { %v1279_v36 = vmin.f32 %v289_v33, %v337_v34  ;;  %v1285_v42 = vmin.f32 %v290_v39, %v338_v38  ;;  %v1319_v58 = vsel %vm84_vm3, %v359_v52, %v360_v49  ;;  %v1322_v59 = vsel %vm71_vm0, %v347_v40, %v348_v50 }
 0x12c   :  { %v369_v63 = vsel %vm84_vm3, %v360_v49, %v1263_v25  ;;  %v467_v14 = vmin.f32 %v463_v56, %v1319_v58  ;;  %v464_v17 = vmin.f32 %v1322_v59, %v1263_v25 }
 0x12d   :  { %475 = vrot.lane.b32.xlu0 %v1279_v36, %s994_s6  ;;  %487 = vrot.lane.b32.xlu1 %v1244_v9, %s995_s7  ;;  %v350_v45 = vrot.slane %v1279_v36, 7  ;;  %v351_v60 = vrot.slane %v1285_v42, 7  ;;  %v363_v4 = vrot.slane %v1285_v42, 1  ;;  %v1350_v19 = vsel %vm64_vm5, %v1263_v25, %v369_v63 }
 0x12e   :  { %v362_v20 = vrot.slane %v1279_v36, 1  ;;  %v468_v39 = vmin.f32 %v464_v17, %v1350_v19 }
 0x12f   :  { %v358_v57 = vsel %vm71_vm0, %v1279_v36, %v350_v45  ;;  %v1354_v21 = vsel %vm71_vm0, %v350_v45, %v351_v60  ;;  %v370_v31 = vsel %vm84_vm3, %v363_v4, %v1285_v42 }
 0x130   :  { %v1337_v12 = vsel %vm61_vm1, %v1279_v36, %v358_v57  ;;  %v1382_v45 = vsel %vm84_vm3, %v362_v20, %v363_v4 }
 0x131   :  { %477 = vrot.lane.b32.xlu0 %v1285_v42, %s994_s6  ;;  %489 = vrot.lane.b32.xlu1 %v1263_v25, %s995_s7  ;;  %v465_v30 = vmin.f32 %v1337_v12, %v1279_v36 }
 0x133   :  { %v469_v52 = vmin.f32 %v465_v30, %v1382_v45 }
 0x135   :  { %491 = vrot.lane.b32.xlu0 %v1279_v36, %s995_s7  ;;  %493 = vrot.lane.b32.xlu1 %v1285_v42, %s995_s7 }
 0x197   :  { %v472_v41 = vpop.permute.xlu0 %471 }
 0x198   :  { %v483_v47 = vsel %vm133_vm2, %v1244_v9, %v472_v41  ;;  %v466_v41 = vmin.f32 %v1354_v21, %v1285_v42 }
 0x199   :  { %v503_v54 = vsel %vm1076_vm4, %v1244_v9, %v483_v47  ;;  %v1387_v47 = vsel %vm64_vm5, %v1285_v42, %v370_v31 }
 0x19a   :  { %v511_v6 = vmin.f32 %v503_v54, %v1244_v9  ;;  %v470_v63 = vmin.f32 %v466_v41, %v1387_v47 }
 0x19b   :  { %v474_v51 = vpop.permute.xlu1 %473 }
 0x19c   :  { %v484_v55 = vsel %vm133_vm2, %v1263_v25, %v474_v51 }
 0x19d   :  { %v504_v7 = vsel %vm1076_vm4, %v1263_v25, %v484_v55 }
 0x19e   :  { %v512_v22 = vmin.f32 %v504_v7, %v1263_v25 }
 0x19f   :  { %v476_v61 = vpop.permute.xlu0 %475  ;;  %v488_v62 = vpop.permute.xlu1 %487 }
 0x1a0   :  { %v499_v11 = vsel %vm150_vm6, %v488_v62, %v1244_v9  ;;  %v485_v13 = vsel %vm133_vm2, %v1279_v36, %v476_v61 }
 0x1a1   :  { %v507_v15 = vsel %vm1095_vm7, %v1244_v9, %v499_v11  ;;  %v505_v32 = vsel %vm1076_vm4, %v1279_v36, %v485_v13 }
 0x1a2   :  { %v515_v18 = vmin.f32 %v511_v6, %v507_v15  ;;  %v513_v50 = vmin.f32 %v505_v32, %v1279_v36 }
 0x1a3   :  { %v478_v26 = vpop.permute.xlu0 %477  ;;  %v490_v27 = vpop.permute.xlu1 %489 }
 0x1a4   :  { %v1364_v33 = vmin.f32 %v467_v14, %v515_v18  ;;  %v486_v34 = vsel %vm133_vm2, %v1285_v42, %v478_v26  ;;  %v500_v35 = vsel %vm150_vm6, %v490_v27, %v1263_v25 }
 0x1a5   :  { %v506_v38 = vsel %vm1076_vm4, %v1285_v42, %v486_v34  ;;  %v508_v40 = vsel %vm1095_vm7, %v1263_v25, %v500_v35 }
 0x1a6   :  { %v516_v43 = vmin.f32 %v512_v22, %v508_v40  ;;  %651 = vrot.lane.b32.xlu0 %v1364_v33, %s994_s6  ;;  %v527_v49 = vrot.slane %v1364_v33, 7  ;;  %v514_v51 = vmin.f32 %v506_v38, %v1285_v42  ;;  %v539_v13 = vrot.slane %v1364_v33, 1 }
 0x1a7   :  { %v492_v54 = vpop.permute.xlu0 %491  ;;  %v494_v55 = vpop.permute.xlu1 %493 }
 0x1a8   :  { %v1393_v56 = vmin.f32 %v468_v39, %v516_v43  ;;  %v501_v57 = vsel %vm150_vm6, %v492_v54, %v1279_v36  ;;  %v502_v60 = vsel %vm150_vm6, %v494_v55, %v1285_v42  ;;  %v537_v61 = vsel %vm71_vm0, %v1364_v33, %v527_v49 }
 0x1a9   :  { %v509_v62 = vsel %vm1095_vm7, %v1279_v36, %v501_v57  ;;  %v510_v4 = vsel %vm1095_vm7, %v1285_v42, %v502_v60  ;;  %v1411_v6 = vsel %vm61_vm1, %v1364_v33, %v537_v61  ;;  %v379_v61 = vmax.f32 %v1304_v48, %v1244_v9 }
 0x1aa   :  { %v517_v7 = vmin.f32 %v513_v50, %v509_v62  ;;  %v518_v11 = vmin.f32 %v514_v51, %v510_v4  ;;  %653 = vrot.lane.b32.xlu1 %v1393_v56, %s994_s6  ;;  %v540_v14 = vrot.slane %v1393_v56, 1  ;;  %v528_v15 = vrot.slane %v1393_v56, 7 }
 0x1ab   :  { %v643_v17 = vmin.f32 %v1411_v6, %v1364_v33  ;;  %v380_v62 = vmax.f32 %v1322_v59, %v1263_v25  ;;  %v381_v48 = vmax.f32 %v1337_v12, %v1279_v36  ;;  %v559_v12 = vmax.f32 %v1411_v6, %v1364_v33 }
 0x1ac   :  { %v1420_v18 = vmin.f32 %v469_v52, %v517_v7  ;;  %v1422_v20 = vmin.f32 %v470_v63, %v518_v11  ;;  %v541_v22 = vsel %vm84_vm3, %v539_v13, %v540_v14  ;;  %v549_v26 = vsel %vm84_vm3, %v540_v14, %v1393_v56 }
 0x1ad   :  { %v529_v27 = vsel %vm71_vm0, %v527_v49, %v528_v15  ;;  %v1428_v30 = vmin.f32 %v643_v17, %v541_v22  ;;  %v556_v31 = vsel %vm64_vm5, %v1393_v56, %v549_v26  ;;  %v1479_v63 = vmax.f32 %v379_v61, %v1319_v58 }
 0x1ae   :  { %655 = vrot.lane.b32.xlu0 %v1420_v18, %s994_s6  ;;  %667 = vrot.lane.b32.xlu1 %v1364_v33, %s995_s7  ;;  %v530_v32 = vrot.slane %v1420_v18, 7  ;;  %v543_v34 = vrot.slane %v1422_v20, 1  ;;  %v542_v35 = vrot.slane %v1420_v18, 1  ;;  %v531_v38 = vrot.slane %v1422_v20, 7 }
 0x1af   :  { %v644_v39 = vmin.f32 %v529_v27, %v1393_v56  ;;  %v1482_v4 = vmax.f32 %v380_v62, %v1350_v19  ;;  %v382_v58 = vmax.f32 %v1354_v21, %v1285_v42  ;;  %v1501_v59 = vmax.f32 %v381_v48, %v1382_v45 }
 0x1b0   :  { %v538_v40 = vsel %vm71_vm0, %v1420_v18, %v530_v32  ;;  %v550_v41 = vsel %vm84_vm3, %v543_v34, %v1422_v20  ;;  %v532_v49 = vsel %vm71_vm0, %v530_v32, %v531_v38  ;;  %v544_v54 = vsel %vm84_vm3, %v542_v35, %v543_v34 }
 0x1b1   :  { %v553_v43 = vsel %vm61_vm1, %v1420_v18, %v538_v40  ;;  %v1450_v50 = vmin.f32 %v644_v39, %v556_v31  ;;  %v558_v51 = vsel %vm64_vm5, %v1422_v20, %v550_v41  ;;  %v646_v55 = vmin.f32 %v532_v49, %v1422_v20 }
 0x1b2   :  { %657 = vrot.lane.b32.xlu0 %v1422_v20, %s994_s6  ;;  %669 = vrot.lane.b32.xlu1 %v1393_v56, %s995_s7  ;;  %v645_v52 = vmin.f32 %v553_v43, %v1420_v18  ;;  %v1504_v19 = vmax.f32 %v382_v58, %v1387_v47  ;;  %v560_v21 = vmax.f32 %v529_v27, %v1393_v56 }
 0x1b3   :  { %v1464_v60 = vmin.f32 %v646_v55, %v558_v51  ;;  %v1525_v45 = vmax.f32 %v559_v12, %v541_v22  ;;  %v561_v7 = vmax.f32 %v553_v43, %v1420_v18  ;;  %v562_v11 = vmax.f32 %v532_v49, %v1422_v20 }
 0x1b4   :  { %v1462_v57 = vmin.f32 %v645_v52, %v544_v54  ;;  %v1527_v47 = vmax.f32 %v560_v21, %v556_v31 }
 0x1b5   :  { %v1535_v6 = vmax.f32 %v561_v7, %v544_v54  ;;  %v1537_v13 = vmax.f32 %v562_v11, %v558_v51 }
 0x1b6   :  { %671 = vrot.lane.b32.xlu0 %v1420_v18, %s995_s7  ;;  %673 = vrot.lane.b32.xlu1 %v1422_v20, %s995_s7 }
 0x1ba   :  { %227 = vrot.lane.b32.xlu0 %v1185_v29, %s994_s6  ;;  %229 = vrot.lane.b32.xlu1 %v1197_v37, %s994_s6 }
 0x1be   :  { %391 = vrot.lane.b32.xlu0 %v1479_v63, %s994_s6  ;;  %393 = vrot.lane.b32.xlu1 %v1482_v4, %s994_s6 }
 0x1c2   :  { %231 = vrot.lane.b32.xlu0 %v1212_v44, %s994_s6  ;;  %233 = vrot.lane.b32.xlu1 %v1217_v46, %s994_s6 }
 0x1c6   :  { %243 = vrot.lane.b32.xlu0 %v1185_v29, %s995_s7  ;;  %245 = vrot.lane.b32.xlu1 %v1197_v37, %s995_s7 }
 0x1ca   :  { %395 = vrot.lane.b32.xlu0 %v1501_v59, %s994_s6  ;;  %397 = vrot.lane.b32.xlu1 %v1504_v19, %s994_s6 }
 0x1ce   :  { %407 = vrot.lane.b32.xlu0 %v1479_v63, %s995_s7  ;;  %409 = vrot.lane.b32.xlu1 %v1482_v4, %s995_s7 }
 0x1d2   :  { %247 = vrot.lane.b32.xlu0 %v1212_v44, %s995_s7  ;;  %249 = vrot.lane.b32.xlu1 %v1217_v46, %s995_s7 }
 0x1d6   :  { %411 = vrot.lane.b32.xlu0 %v1501_v59, %s995_s7  ;;  %413 = vrot.lane.b32.xlu1 %v1504_v19, %s995_s7 }
 0x1da   :  { %571 = vrot.lane.b32.xlu0 %v1525_v45, %s994_s6  ;;  %573 = vrot.lane.b32.xlu1 %v1527_v47, %s994_s6 }
 0x1de   :  { %575 = vrot.lane.b32.xlu0 %v1535_v6, %s994_s6  ;;  %577 = vrot.lane.b32.xlu1 %v1537_v13, %s994_s6 }
 0x1e2   :  { %587 = vrot.lane.b32.xlu0 %v1525_v45, %s995_s7  ;;  %589 = vrot.lane.b32.xlu1 %v1527_v47, %s995_s7 }
 0x1e6   :  { %591 = vrot.lane.b32.xlu0 %v1535_v6, %s995_s7  ;;  %593 = vrot.lane.b32.xlu1 %v1537_v13, %s995_s7 }
 0x218   :  { %v652_v14 = vpop.permute.xlu0 %651 }
 0x219   :  { %v663_v15 = vsel %vm133_vm2, %v1364_v33, %v652_v14 }
 0x21a   :  { %v683_v22 = vsel %vm1076_vm4, %v1364_v33, %v663_v15 }
 0x21b   :  { %v691_v32 = vmin.f32 %v683_v22, %v1364_v33 }
 0x21c   :  { %v654_v17 = vpop.permute.xlu1 %653 }
 0x21d   :  { %v664_v26 = vsel %vm133_vm2, %v1393_v56, %v654_v17 }
 0x21e   :  { %v684_v34 = vsel %vm1076_vm4, %v1393_v56, %v664_v26 }
 0x21f   :  { %v692_v41 = vmin.f32 %v684_v34, %v1393_v56 }
 0x220   :  { %v656_v27 = vpop.permute.xlu0 %655  ;;  %v668_v31 = vpop.permute.xlu1 %667 }
 0x221   :  { %v679_v35 = vsel %vm150_vm6, %v668_v31, %v1364_v33  ;;  %v665_v38 = vsel %vm133_vm2, %v1420_v18, %v656_v27 }
 0x222   :  { %v687_v39 = vsel %vm1095_vm7, %v1364_v33, %v679_v35  ;;  %v685_v51 = vsel %vm1076_vm4, %v1420_v18, %v665_v38 }
 0x223   :  { %v695_v40 = vmin.f32 %v691_v32, %v687_v39  ;;  %v693_v12 = vmin.f32 %v685_v51, %v1420_v18 }
 0x224   :  { %v658_v43 = vpop.permute.xlu0 %657  ;;  %v670_v49 = vpop.permute.xlu1 %669 }
 0x225   :  { %v699_v52 = vmin.f32 %v1428_v30, %v695_v40  ;;  %v666_v54 = vsel %vm133_vm2, %v1422_v20, %v658_v43  ;;  %v680_v55 = vsel %vm150_vm6, %v670_v49, %v1393_v56 }
 0x226   :  { %v688_v61 = vsel %vm1095_vm7, %v1393_v56, %v680_v55  ;;  %v686_v48 = vsel %vm1076_vm4, %v1422_v20, %v666_v54 }
 0x227   :  { %v707_v62 = vrot.slane %v699_v52, 7  ;;  %v696_v58 = vmin.f32 %v692_v41, %v688_v61  ;;  %v694_v22 = vmin.f32 %v686_v48, %v1422_v20 }
 0x228   :  { %v672_v21 = vpop.permute.xlu0 %671  ;;  %v674_v30 = vpop.permute.xlu1 %673 }
 0x229   :  { %v717_v7 = vsel %vm71_vm0, %v699_v52, %v707_v62  ;;  %v700_v11 = vmin.f32 %v1450_v50, %v696_v58  ;;  %v681_v14 = vsel %vm150_vm6, %v672_v21, %v1420_v18  ;;  %v682_v15 = vsel %vm150_vm6, %v674_v30, %v1422_v20 }
 0x22a   :  { %v731_v17 = vsel %vm61_vm1, %v699_v52, %v717_v7  ;;  %v689_v26 = vsel %vm1095_vm7, %v1420_v18, %v681_v14  ;;  %v690_v27 = vsel %vm1095_vm7, %v1422_v20, %v682_v15  ;;  %v719_v50 = vrot.slane %v699_v52, 1 }
 0x22b   :  { %v708_v31 = vrot.slane %v700_v11, 7  ;;  %v720_v32 = vrot.slane %v700_v11, 1  ;;  %v697_v34 = vmin.f32 %v693_v12, %v689_v26  ;;  %v739_v35 = vmax.f32 %v731_v17, %v699_v52 }
 0x22c   :  { %v698_v38 = vmin.f32 %v694_v22, %v690_v27  ;;  %v230_v10 = vpop.permute.xlu1 %229  ;;  %v228_v17 = vpop.permute.xlu0 %227 }
 0x22d   :  { %v709_v39 = vsel %vm71_vm0, %v707_v62, %v708_v31  ;;  %v721_v40 = vsel %vm84_vm3, %v719_v50, %v720_v32  ;;  %v729_v41 = vsel %vm84_vm3, %v720_v32, %v700_v11  ;;  %v701_v43 = vmin.f32 %v1462_v57, %v697_v34 }
 0x22e   :  { %v736_v49 = vsel %vm64_vm5, %v700_v11, %v729_v41  ;;  %v740_v51 = vmax.f32 %v709_v39, %v700_v11  ;;  %v702_v54 = vmin.f32 %v1464_v60, %v698_v38  ;;  %v1610_v12 = vmax.f32 %v739_v35, %v721_v40 }
 0x22f   :  { %v710_v55 = vrot.slane %v701_v43, 7  ;;  %v722_v61 = vrot.slane %v701_v43, 1 }
 0x230   :  { %v1607_v48 = vmax.f32 %v740_v51, %v736_v49  ;;  %v711_v52 = vrot.slane %v702_v54, 7  ;;  %v723_v58 = vrot.slane %v702_v54, 1  ;;  %751 = vrot.lane.b32.xlu0 %v1610_v12, %s994_s6  ;;  %v394_v22 = vpop.permute.xlu1 %393  ;;  %v392_v26 = vpop.permute.xlu0 %391 }
 0x231   :  { %v718_v62 = vsel %vm71_vm0, %v701_v43, %v710_v55  ;;  %v404_v51 = vsel %vm133_vm2, %v1482_v4, %v394_v22 }
 0x232   :  { %v733_v21 = vsel %vm61_vm1, %v701_v43, %v718_v62  ;;  %v712_v57 = vsel %vm71_vm0, %v710_v55, %v711_v52  ;;  %v724_v30 = vsel %vm84_vm3, %v722_v61, %v723_v58  ;;  %v730_v7 = vsel %vm84_vm3, %v723_v58, %v702_v54  ;;  %753 = vrot.lane.b32.xlu1 %v1607_v48, %s994_s6 }
 0x233   :  { %v741_v60 = vmax.f32 %v733_v21, %v701_v43  ;;  %v738_v11 = vsel %vm64_vm5, %v702_v54, %v730_v7  ;;  %v742_v14 = vmax.f32 %v712_v57, %v702_v54  ;;  %v240_v54 = vsel %vm133_vm2, %v1197_v37, %v230_v10 }
 0x234   :  { %v234_v27 = vpop.permute.xlu1 %233  ;;  %v232_v50 = vpop.permute.xlu0 %231  ;;  %v403_v55 = vsel %vm133_vm2, %v1479_v63, %v392_v26  ;;  %v239_v58 = vsel %vm133_vm2, %v1185_v29, %v228_v17  ;;  %v424_v62 = vsel %vm1076_vm4, %v1482_v4, %v404_v51 }
 0x235   :  { %v1623_v15 = vmax.f32 %v742_v14, %v738_v11  ;;  %v1625_v5 = vmax.f32 %v741_v60, %v724_v30  ;;  %v260_v30 = vsel %vm1076_vm4, %v1197_v37, %v240_v54  ;;  %v423_v7 = vsel %vm1076_vm4, %v1479_v63, %v403_v55 }
 0x236   :  { %v259_v10 = vsel %vm1076_vm4, %v1185_v29, %v239_v58  ;;  %v432_v17 = vmax.f32 %v424_v62, %v1482_v4  ;;  %v268_v26 = vmax.f32 %v260_v30, %v1197_v37 }
 0x237   :  { %757 = vrot.lane.b32.xlu1 %v1623_v15, %s994_s6  ;;  %755 = vrot.lane.b32.xlu0 %v1625_v5, %s994_s6  ;;  %v267_v55 = vmax.f32 %v259_v10, %v1185_v29 }
 0x238   :  { %v246_v31 = vpop.permute.xlu1 %245  ;;  %v244_v32 = vpop.permute.xlu0 %243 }
 0x239   :  { %v256_v21 = vsel %vm150_vm6, %v246_v31, %v1197_v37  ;;  %v255_v11 = vsel %vm150_vm6, %v244_v32, %v1185_v29  ;;  %v431_v31 = vmax.f32 %v423_v7, %v1479_v63 }
 0x23a   :  { %v264_v22 = vsel %vm1095_vm7, %v1197_v37, %v256_v21 }
 0x23b   :  { %769 = vrot.lane.b32.xlu1 %v1607_v48, %s995_s7  ;;  %767 = vrot.lane.b32.xlu0 %v1610_v12, %s995_s7 }
 0x23c   :  { %v398_v34 = vpop.permute.xlu1 %397  ;;  %v396_v35 = vpop.permute.xlu0 %395 }
 0x23d   :  { %v406_v32 = vsel %vm133_vm2, %v1504_v19, %v398_v34  ;;  %v405_v51 = vsel %vm133_vm2, %v1501_v59, %v396_v35 }
 0x23f   :  { %773 = vrot.lane.b32.xlu1 %v1623_v15, %s995_s7  ;;  %771 = vrot.lane.b32.xlu0 %v1625_v5, %s995_s7 }
 0x240   :  { %v410_v38 = vpop.permute.xlu1 %409  ;;  %v408_v39 = vpop.permute.xlu0 %407 }
 0x241   :  { %v420_v61 = vsel %vm150_vm6, %v410_v38, %v1482_v4  ;;  %v419_v60 = vsel %vm150_vm6, %v408_v39, %v1479_v63  ;;  %v242_v39 = vsel %vm133_vm2, %v1217_v46, %v234_v27  ;;  %v426_v27 = vsel %vm1076_vm4, %v1504_v19, %v406_v32 }
 0x242   :  { %v428_v14 = vsel %vm1095_vm7, %v1482_v4, %v420_v61  ;;  %v427_v38 = vsel %vm1095_vm7, %v1479_v63, %v419_v60  ;;  %v263_v4 = vsel %vm1095_vm7, %v1185_v29, %v255_v11  ;;  %v272_v61 = vmax.f32 %v268_v26, %v264_v22 }
 0x243   :  { %v436_v37 = vmax.f32 %v432_v17, %v428_v14  ;;  %v241_v63 = vsel %vm133_vm2, %v1212_v44, %v232_v50  ;;  %v435_v62 = vmax.f32 %v431_v31, %v427_v38  ;;  %v262_v29 = vsel %vm1076_vm4, %v1217_v46, %v242_v39 }
 0x244   :  { %v250_v40 = vpop.permute.xlu1 %249  ;;  %v248_v41 = vpop.permute.xlu0 %247  ;;  %v271_v21 = vmax.f32 %v267_v55, %v263_v4  ;;  %v261_v60 = vsel %vm1076_vm4, %v1212_v44, %v241_v63  ;;  %v276_v11 = vsub.f32 %v1044_v2, %v272_v61  ;;  %v434_v14 = vmax.f32 %v426_v27, %v1504_v19 }
 0x245   :  { %v258_v50 = vsel %vm150_vm6, %v250_v40, %v1217_v46  ;;  %v440_v30 = vsub.f32 %v1150_v8, %v436_v37  ;;  %v257_v7 = vsel %vm150_vm6, %v248_v41, %v1212_v44  ;;  %v270_v8 = vmax.f32 %v262_v29, %v1217_v46 }
 0x246   :  { %v439_v10 = vsub.f32 %v1132_v53, %v435_v62  ;;  %v266_v17 = vsel %vm1095_vm7, %v1217_v46, %v258_v50  ;;  %v275_v26 = vsub.f32 %v1036_v0, %v271_v21  ;;  %v280_v4 = vmax.f32 %v276_v11, 0.0 }
 0x247   :  { %v444_v39 = vmax.f32 %v440_v30, 0.0 }
 0x248   :  { %v414_v43 = vpop.permute.xlu1 %413  ;;  %v412_v49 = vpop.permute.xlu0 %411  ;;  %v443_v37 = vmax.f32 %v439_v10, 0.0 }
 0x249   :  { %v422_v34 = vsel %vm150_vm6, %v414_v43, %v1504_v19  ;;  %v421_v35 = vsel %vm150_vm6, %v412_v49, %v1501_v59  ;;  %v425_v43 = vsel %vm1076_vm4, %v1501_v59, %v405_v51  ;;  %v274_v51 = vmax.f32 %v270_v8, %v266_v17 }
 0x24a   :  { %v430_v49 = vsel %vm1095_vm7, %v1504_v19, %v422_v34  ;;  %v429_v40 = vsel %vm1095_vm7, %v1501_v59, %v421_v35  ;;  %v433_v41 = vmax.f32 %v425_v43, %v1501_v59  ;;  %v265_v19 = vsel %vm1095_vm7, %v1212_v44, %v257_v7 }
 0x24b   :  { %v438_v31 = vmax.f32 %v434_v14, %v430_v49  ;;  %v269_v59 = vmax.f32 %v261_v60, %v1212_v44  ;;  %v448_v44 = vmul.f32 %v444_v39, %v280_v4 }
 0x24c   :  { %v574_v52 = vpop.permute.xlu1 %573  ;;  %v572_v57 = vpop.permute.xlu0 %571  ;;  %v437_v53 = vmax.f32 %v433_v41, %v429_v40 }
 0x24d   :  { %v584_v32 = vsel %vm133_vm2, %v1527_v47, %v574_v52  ;;  %v273_v55 = vmax.f32 %v269_v59, %v265_v19  ;;  %v583_v61 = vsel %vm133_vm2, %v1525_v45, %v572_v57  ;;  %v279_v52 = vmax.f32 %v275_v26, 0.0 }
 0x24e   :  { %v604_v34 = vsel %vm1076_vm4, %v1527_v47, %v584_v32  ;;  %v442_v63 = vsub.f32 %v1173_v23, %v438_v31  ;;  %v441_v27 = vsub.f32 %v1175_v24, %v437_v53  ;;  %v278_v57 = vsub.f32 %v1050_v3, %v274_v51 }
 0x24f   :  { %v603_v21 = vsel %vm1076_vm4, %v1525_v45, %v583_v61  ;;  %v612_v43 = vmax.f32 %v604_v34, %v1527_v47  ;;  %v447_v50 = vmul.f32 %v443_v37, %v279_v52  ;;  %v277_v30 = vsub.f32 %v1038_v1, %v273_v55 }
 0x250   :  { %v578_v54 = vpop.permute.xlu1 %577  ;;  %v576_v58 = vpop.permute.xlu0 %575  ;;  %v446_v49 = vmax.f32 %v442_v63, 0.0  ;;  %v611_v40 = vmax.f32 %v603_v21, %v1525_v45  ;;  %v282_v41 = vmax.f32 %v278_v57, 0.0  ;;  %v823_v61 = vmul.f32 %v1038_v1, %v1036_v0  ;;  %v1789_v0 = vld [vmem:[#allocation2 + $0x8] sm:$0xff] }
 0x251   :  { %v586_v23 = vsel %vm133_vm2, %v1537_v13, %v578_v54  ;;  %v585_v7 = vsel %vm133_vm2, %v1535_v6, %v576_v58  ;;  %v452_v58 = vsub.f32 %v444_v39, %v448_v44  ;;  %v281_v17 = vmax.f32 %v277_v30, 0.0 }
 0x252   :  { %v606_v54 = vsel %vm1076_vm4, %v1537_v13, %v586_v23  ;;  %v605_v10 = vsel %vm1076_vm4, %v1535_v6, %v585_v7 }
 0x253   :  { %v614_v19 = vmax.f32 %v606_v54, %v1537_v13  ;;  %v613_v39 = vmax.f32 %v605_v10, %v1535_v6  ;;  %v456_v53 = vmax.f32 %v452_v58, 0.0  ;;  %v1807_v58 = vld [vmem:[#allocation5 + $0x8] sm:$0xff] }
 0x254   :  { %v590_v22 = vpop.permute.xlu1 %589  ;;  %v588_v38 = vpop.permute.xlu0 %587 }
 0x255   :  { %v600_v46 = vsel %vm150_vm6, %v590_v22, %v1527_v47  ;;  %v599_v62 = vsel %vm150_vm6, %v588_v38, %v1525_v45  ;;  %v451_v38 = vsub.f32 %v443_v37, %v447_v50 }
 0x256   :  { %v608_v35 = vsel %vm1095_vm7, %v1527_v47, %v600_v46  ;;  %v607_v60 = vsel %vm1095_vm7, %v1525_v45, %v599_v62  ;;  %v445_v47 = vmax.f32 %v441_v27, 0.0  ;;  %v450_v45 = vmul.f32 %v446_v49, %v282_v41 }
 0x257   :  { %v616_v11 = vmax.f32 %v612_v43, %v608_v35  ;;  %v615_v22 = vmax.f32 %v611_v40, %v607_v60  ;;  %v455_v63 = vmax.f32 %v451_v38, 0.0  ;;  %v460_v27 = vadd.f32 %v456_v53, %v280_v4  ;;  %v1787_v43 = vld [vmem:[#allocation2] sm:$0xff] }
 0x258   :  { %v594_v29 = vpop.permute.xlu1 %593  ;;  %v592_v24 = vpop.permute.xlu0 %591  ;;  %v449_v59 = vmul.f32 %v445_v47, %v281_v17  ;;  %v832_v1 = vadd.f32 %v1789_v0, %v1787_v43 }
 0x259   :  { %v602_v14 = vsel %vm150_vm6, %v594_v29, %v1537_v13  ;;  %v601_v8 = vsel %vm150_vm6, %v592_v24, %v1535_v6  ;;  %v620_v31 = vsub.f32 %v1263_v25, %v616_v11  ;;  %v619_v46 = vsub.f32 %v1244_v9, %v615_v22 }
 0x25a   :  { %v610_v26 = vsel %vm1095_vm7, %v1537_v13, %v602_v14  ;;  %v609_v32 = vsel %vm1095_vm7, %v1535_v6, %v601_v8  ;;  %v824_v13 = vmul.f32 %v1050_v3, %v1044_v2  ;;  %v454_v25 = vsub.f32 %v446_v49, %v450_v45  ;;  %v1805_v8 = vld [vmem:[#allocation5] sm:$0xff] }
 0x25b   :  { %v618_v51 = vmax.f32 %v614_v19, %v610_v26  ;;  %v617_v55 = vmax.f32 %v613_v39, %v609_v32  ;;  %v624_v34 = vmax.f32 %v620_v31, 0.0  ;;  %v453_v44 = vsub.f32 %v445_v47, %v449_v59 }
 0x25c   :  { %v623_v6 = vmax.f32 %v619_v46, 0.0  ;;  %v825_v29 = vadd.f32 %v824_v13, %v823_v61  ;;  %v458_v9 = vmax.f32 %v454_v25, 0.0  ;;  %v459_v3 = vadd.f32 %v455_v63, %v279_v52 }
 0x25d   :  { %v622_v37 = vsub.f32 %v1285_v42, %v618_v51  ;;  %v621_v35 = vsub.f32 %v1279_v36, %v617_v55  ;;  %v628_v57 = vmul.f32 %v624_v34, %v460_v27  ;;  %v457_v2 = vmax.f32 %v453_v44, 0.0 }
 0x25e   :  { %v627_v23 = vmul.f32 %v623_v6, %v459_v3  ;;  %v826_v30 = vrot.slane %v825_v29, 4  ;;  %v462_v49 = vadd.f32 %v458_v9, %v282_v41  ;;  %v833_v11 = vrot.slane %v832_v1, 4 }
 0x25f   :  { %v626_v4 = vmax.f32 %v622_v37, 0.0  ;;  %v625_v24 = vmax.f32 %v621_v35, 0.0  ;;  %v632_v7 = vsub.f32 %v624_v34, %v628_v57  ;;  %v461_v14 = vadd.f32 %v457_v2, %v281_v17 }
 0x260   :  { %v839_v41 = vadd.f32 %v1807_v58, %v1805_v8  ;;  %v631_v10 = vsub.f32 %v623_v6, %v627_v23  ;;  %v827_v45 = vadd.f32 %v826_v30, %v825_v29  ;;  %v834_v59 = vadd.f32 %v833_v11, %v832_v1 }
 0x261   :  { %v630_v47 = vmul.f32 %v626_v4, %v462_v49  ;;  %v629_v17 = vmul.f32 %v625_v24, %v461_v14  ;;  %v636_v19 = vmax.f32 %v632_v7, 0.0 }
 0x262   :  { %v635_v34 = vmax.f32 %v631_v10, 0.0  ;;  %v828_v30 = vrot.slane %v827_v45, 2  ;;  %v835_v7 = vrot.slane %v834_v59, 2 }
 0x263   :  { %v634_v55 = vsub.f32 %v626_v4, %v630_v47  ;;  %v633_v63 = vsub.f32 %v625_v24, %v629_v17  ;;  %v640_v6 = vadd.f32 %v636_v19, %v460_v27 }
 0x265   :  { %v638_v1 = vmax.f32 %v634_v55, 0.0  ;;  %v637_v4 = vmax.f32 %v633_v63, 0.0 }
 0x267   :  { %v642_v11 = vadd.f32 %v638_v1, %v462_v49 }
 0x2a2   :  { %v752_v21 = vpop.permute.xlu0 %751 }
 0x2a3   :  { %v763_v36 = vsel %vm133_vm2, %v1610_v12, %v752_v21 }
 0x2a4   :  { %v754_v62 = vpop.permute.xlu1 %753  ;;  %v783_v40 = vsel %vm1076_vm4, %v1610_v12, %v763_v36 }
 0x2a5   :  { %v764_v42 = vsel %vm133_vm2, %v1607_v48, %v754_v62  ;;  %v791_v39 = vmax.f32 %v783_v40, %v1610_v12  ;;  %v840_v62 = vrot.slane %v839_v41, 4 }
 0x2a6   :  { %v784_v52 = vsel %vm1076_vm4, %v1607_v48, %v764_v42  ;;  %v639_v42 = vadd.f32 %v635_v34, %v459_v3 }
 0x2a7   :  { %v792_v31 = vmax.f32 %v784_v52, %v1607_v48  ;;  %v841_v47 = vadd.f32 %v840_v62, %v839_v41 }
 0x2a9   :  { %v758_v50 = vpop.permute.xlu1 %757  ;;  %v756_v60 = vpop.permute.xlu0 %755 }
 0x2aa   :  { %v766_v54 = vsel %vm133_vm2, %v1623_v15, %v758_v50  ;;  %v765_v22 = vsel %vm133_vm2, %v1625_v5, %v756_v60 }
 0x2ab   :  { %v786_v53 = vsel %vm1076_vm4, %v1623_v15, %v766_v54  ;;  %v785_v61 = vsel %vm1076_vm4, %v1625_v5, %v765_v22  ;;  %v641_v54 = vadd.f32 %v637_v4, %v461_v14  ;;  %v829_v22 = vadd.f32 %v828_v30, %v827_v45 }
 0x2ac   :  { %v793_v9 = vmax.f32 %v785_v61, %v1625_v5 }
 0x2ad   :  { %v770_v26 = vpop.permute.xlu1 %769  ;;  %v768_v38 = vpop.permute.xlu0 %767 }
 0x2ae   :  { %v780_v32 = vsel %vm150_vm6, %v770_v26, %v1607_v48  ;;  %v779_v46 = vsel %vm150_vm6, %v768_v38, %v1610_v12 }
 0x2af   :  { %v788_v51 = vsel %vm1095_vm7, %v1607_v48, %v780_v32  ;;  %v787_v25 = vsel %vm1095_vm7, %v1610_v12, %v779_v46  ;;  %v794_v48 = vmax.f32 %v786_v53, %v1623_v15 }
 0x2b0   :  { %v796_v13 = vmax.f32 %v792_v31, %v788_v51  ;;  %v795_v44 = vmax.f32 %v791_v39, %v787_v25  ;;  %v842_v31 = vrot.slane %v841_v47, 2  ;;  %v830_v51 = vrot.slane %v829_v22, 1 }
 0x2b1   :  { %v774_v37 = vpop.permute.xlu1 %773  ;;  %v772_v16 = vpop.permute.xlu0 %771 }
 0x2b2   :  { %v800_v35 = vsub.f32 %v1393_v56, %v796_v13  ;;  %v782_v29 = vsel %vm150_vm6, %v774_v37, %v1623_v15  ;;  %v799_v57 = vsub.f32 %v1364_v33, %v795_v44  ;;  %v781_v21 = vsel %vm150_vm6, %v772_v16, %v1625_v5 }
 0x2b3   :  { %v790_v12 = vsel %vm1095_vm7, %v1623_v15, %v782_v29  ;;  %v789_v56 = vsel %vm1095_vm7, %v1625_v5, %v781_v21  ;;  %v843_v55 = vadd.f32 %v842_v31, %v841_v47 }
 0x2b4   :  { %v804_v2 = vmax.f32 %v800_v35, 0.0  ;;  %v798_v27 = vmax.f32 %v794_v48, %v790_v12  ;;  %v803_v23 = vmax.f32 %v799_v57, 0.0  ;;  %v797_v24 = vmax.f32 %v793_v9, %v789_v56 }
 0x2b5   :  { %v844_v62 = vrot.slane %v843_v55, 1 }
 0x2b6   :  { %v808_v36 = vmul.f32 %v804_v2, %v640_v6  ;;  %v802_v33 = vsub.f32 %v1422_v20, %v798_v27  ;;  %v807_v50 = vmul.f32 %v803_v23, %v639_v42  ;;  %v801_v15 = vsub.f32 %v1420_v18, %v797_v24 }
 0x2b7   :  { %v836_v20 = vadd.f32 %v835_v7, %v834_v59  ;;  %v845_v57 = vadd.f32 %v844_v62, %v843_v55 }
 0x2b8   :  { %v812_v60 = vsub.f32 %v804_v2, %v808_v36  ;;  %v806_v52 = vmax.f32 %v802_v33, 0.0  ;;  %v811_v40 = vsub.f32 %v803_v23, %v807_v50  ;;  %v805_v28 = vmax.f32 %v801_v15, 0.0 }
 0x2b9   :  { %v837_v46 = vrot.slane %v836_v20, 1 }
 0x2ba   :  { %v816_v5 = vmax.f32 %v812_v60, 0.0  ;;  %v810_v10 = vmul.f32 %v806_v52, %v642_v11  ;;  %v815_v3 = vmax.f32 %v811_v40, 0.0  ;;  %v809_v17 = vmul.f32 %v805_v28, %v641_v54 }
 0x2bb   :  { %v838_v37 = vadd.f32 %v837_v46, %v836_v20 }
 0x2bc   :  { %v820_v26 = vadd.f32 %v816_v5, %v640_v6  ;;  %v814_v19 = vsub.f32 %v806_v52, %v810_v10  ;;  %v819_v32 = vadd.f32 %v815_v3, %v639_v42  ;;  %v813_v18 = vsub.f32 %v805_v28, %v809_v17 }
 0x2be   :  { %v847_v38 = vmul.f32 %v1807_v58, %v820_v26  ;;  %v818_v39 = vmax.f32 %v814_v19, 0.0  ;;  %v846_v49 = vmul.f32 %v1805_v8, %v819_v32  ;;  %v855_v41 = vadd.f32 %v820_v26, %v819_v32 }
 0x2bf   :  { %v817_v53 = vmax.f32 %v813_v18, 0.0  ;;  %v831_v58 = vadd.f32 %v830_v51, %v829_v22 }
 0x2c0   :  { %v822_v14 = vadd.f32 %v818_v39, %v642_v11  ;;  %v848_v61 = vadd.f32 %v847_v38, %v846_v49  ;;  %v856_v13 = vrot.slane %v855_v41, 4 }
 0x2c1   :  { %v821_v45 = vadd.f32 %v817_v53, %v641_v54  ;;  %v878_v21 = vsel %vm71_vm0, %v831_v58, %v838_v37 }
 0x2c2   :  { %v863_v25 = vmul.f32 %v1789_v0, %v822_v14  ;;  %v849_v59 = vrot.slane %v848_v61, 4  ;;  %v857_v34 = vadd.f32 %v856_v13, %v855_v41  ;;  %v880_v42 = vsel %vm879_vm8, %v878_v21, %v845_v57 }
 0x2c3   :  { %v862_v63 = vmul.f32 %v1787_v43, %v821_v45  ;;  %v871_v44 = vadd.f32 %v822_v14, %v821_v45 }
 0x2c4   :  { %v850_v8 = vadd.f32 %v849_v59, %v848_v61  ;;  %v858_v6 = vrot.slane %v857_v34, 2 }
 0x2c5   :  { %v864_v48 = vadd.f32 %v863_v25, %v862_v63  ;;  %v872_v35 = vrot.slane %v871_v44, 4 }
 0x2c6   :  { %v851_v29 = vrot.slane %v850_v8, 2  ;;  %v859_v12 = vadd.f32 %v858_v6, %v857_v34 }
 0x2c7   :  { %v865_v16 = vrot.slane %v864_v48, 4  ;;  %v873_v9 = vadd.f32 %v872_v35, %v871_v44 }
 0x2c8   :  { %v852_v0 = vadd.f32 %v851_v29, %v850_v8  ;;  %v860_v4 = vrot.slane %v859_v12, 1 }
 0x2c9   :  { %v866_v1 = vadd.f32 %v865_v16, %v864_v48  ;;  %v874_v2 = vrot.slane %v873_v9, 2 }
 0x2ca   :  { %v853_v43 = vrot.slane %v852_v0, 1  ;;  %v861_v15 = vadd.f32 %v860_v4, %v859_v12 }
 0x2cb   :  { %v867_v27 = vrot.slane %v866_v1, 2  ;;  %v875_v56 = vadd.f32 %v874_v2, %v873_v9 }
 0x2cc   :  { %v854_v23 = vadd.f32 %v853_v43, %v852_v0 }
 0x2cd   :  { %v868_v24 = vadd.f32 %v867_v27, %v866_v1  ;;  %v876_v36 = vrot.slane %v875_v56, 1 }
 0x2ce   :  { %v882_v50 = vsel %vm881_vm9, %v880_v42, %v854_v23 }
 0x2cf   :  { %v869_v33 = vrot.slane %v868_v24, 1  ;;  %v877_v7 = vadd.f32 %v876_v36, %v875_v56  ;;  %v884_v60 = vsel %vm883_vm10, %v882_v50, %v861_v15 }
 0x2d1   :  { %v870_v30 = vadd.f32 %v869_v33, %v868_v24 }
 0x2d3   :  { %v886_v11 = vsel %vm885_vm11, %v884_v60, %v870_v30 }
 0x2d4   :  { %v888_v52 = vsel %vm887_vm12, %v886_v11, %v877_v7 }
 0x2d5   :  { %v889_v47 = vsel %vm84_vm3, %v888_v52, 0.0 }
 0x2d6   :  { %890 = vst [vmem:[#allocation7] sm:$0xff] %v889_v47 }
 0x2d7   :  { %973 = shalt.err (!%p970_p6)
}
 0x2d8   :  { %s974_s12 = scalar_lea.hbm %s1867_s2, 128 }
 0x2d9   :  { %p975_p7 = scmp.ne.s32.totalorder %s1867_s2, %s974_s12  ;;  %p978_p8 = scmp.lt.u32.totalorder %s974_s12, %s1867_s2 }
 0x2db   :  { %p980_p9 = pnand %p978_p8, %p975_p7 }
 0x2dd   :  { %983 = shalt.err (!%p980_p9)
}
 0x2de   :  { %900 = dma.vmem_to_hbm [thread:$0]  %s898_s8, 128, %s1867_s2, [#allocation4]  }
 0x2df   :  { %988 = dma.done.wait [#allocation4], 128  }
 0x2e0   :  { %989 = vsyncadd [#allocation4], 4294967168 }
 0x2e1   :  { %904 = vsyncpa [#allocation3], 1 }
 0x2e2   :  { %905 = vsyncpa [#allocation6], 1 }
 0x2e3   :  { %906 = vsyncpa [#allocation4], 1 }

</bundles_post_ra>
